<compile_context>
chip_gen: v7x
topology: tpu7x:2x2x1
jax: 0.10.0
libtpu: 0.0.40
codegen_flags: <defaults>
</compile_context>

<pallas_src>
import functools

import jax
import jax.numpy as jnp
import numpy as np
from jax import lax
from jax.experimental import pallas as pl
from jax.experimental.pallas import tpu as pltpu


# ---------------------------------------------------------------------------
# exact-GELU helper (erf via Abramowitz&Stegun 7.1.26, |err| < 1.5e-7 ~ f32 eps)
# TODO(synk): polynomial erf approximation instead of lax.erf inside the kernel;
#             matches PyTorch's exact (erf-based) nn.GELU to ~1e-7.
# ---------------------------------------------------------------------------
def _erf(x):
    a1, a2, a3, a4, a5 = 0.254829592, -0.284496736, 1.421413741, -1.453152027, 1.061405429
    p = 0.3275911
    ax = jnp.abs(x)
    t = 1.0 / (1.0 + p * ax)
    poly = ((((a5 * t + a4) * t + a3) * t + a2) * t + a1) * t
    y = 1.0 - poly * jnp.exp(-ax * ax)
    return jnp.where(x >= 0, y, -y)


def _gelu(x):
    return 0.5 * x * (1.0 + _erf(x * 0.7071067811865476))


# ---------------------------------------------------------------------------
# Fused kernel: conv1 -> GN/FiLM -> GELU -> conv2 -> GN/FiLM -> x + GELU(x)
# One grid step == one batch element.  All activations are [C, H*W] in-kernel.
# ---------------------------------------------------------------------------
def _unet_conv_kernel(colid_ref, x_ref, w1_ref, w2_ref, m1_ref, m2_ref,
                      film1_ref, film2_ref, out_ref, *, H, W, groups, eps):
    HW = H * W
    col = colid_ref[...]                 # [1, HW] int32: column index of each pixel
    edge_l = col == 0                    # first column of each image row
    edge_r = col == (W - 1)              # last column of each image row

    def circular_patches(v):
        """v: [C, HW].  Returns the im2col matrix [9*C, HW] for a 3x3 circular conv:
        tap (ky, kx) block is v[(y+ky-1) % H, (x+kx-1) % W] per channel."""

        def hshift(u, s):                # circular roll along W by s (s = +-1)
            main = pltpu.roll(u, s % HW, axis=1)
            wrap_shift = (s - W) % HW if s > 0 else (s + W) % HW
            wrap = pltpu.roll(u, wrap_shift, axis=1)
            edge = edge_l if s > 0 else edge_r
            return jnp.where(edge, wrap, main)

        def vshift(u, s):                # circular roll along H == flat roll by s*W
            if s == 0:
                return u
            return pltpu.roll(u, (s * W) % HW, axis=1)

        hs = {1: hshift(v, 1), 0: v, -1: hshift(v, -1)}
        taps = []
        for ky in range(3):
            for kx in range(3):
                taps.append(vshift(hs[1 - kx], 1 - ky))
        return jnp.concatenate(taps, axis=0)          # [9*C, HW]

    def gn_film(acc, m_ref, film_ref):
        """GroupNorm (two-pass, biased var) + fused FiLM/affine.  acc: [C, HW]."""
        C = acc.shape[0]
        n = float(HW * (C // groups))
        ch_sum = jnp.sum(acc, axis=1, keepdims=True)                        # [C, 1]
        mean_c = jnp.dot(m_ref[...], ch_sum,
                         preferred_element_type=jnp.float32) * (1.0 / n)    # [C, 1]
        centered = acc - mean_c
        ch_var = jnp.sum(centered * centered, axis=1, keepdims=True)        # [C, 1]
        var_c = jnp.dot(m_ref[...], ch_var,
                        preferred_element_type=jnp.float32) * (1.0 / n)     # [C, 1]
        inv_c = lax.rsqrt(var_c + eps)
        film = film_ref[0]                                                  # [C, 2]
        scale = film[:, 0:1]
        bias = film[:, 1:2]
        return scale * (centered * inv_c) + bias

    # ---- stage 1 ----
    x = x_ref[0]                                                            # [Cp, HW]
    p1 = circular_patches(x)                                                # [9*Cp, HW]
    a1 = jnp.dot(w1_ref[...], p1, preferred_element_type=jnp.float32)       # [C1, HW]
    h = _gelu(gn_film(a1, m1_ref, film1_ref))

    # ---- stage 2 ----
    p2 = circular_patches(h)                                                # [9*C1, HW]
    a2 = jnp.dot(w2_ref[...], p2, preferred_element_type=jnp.float32)       # [C2, HW]
    g2 = gn_film(a2, m2_ref, film2_ref)
    out_ref[0] = g2 + _gelu(g2)                                             # x + GELU(x)


# ---------------------------------------------------------------------------
# Wrapper-side helpers (tiny JAX glue, fused by XLA around the pallas_call)
# ---------------------------------------------------------------------------
def _im2col_weight(w, cin_pad):
    """w: [co, ci, 3, 3] (PyTorch layout) -> [co, 9*cin_pad], tap-major / chan-minor."""
    ci = w.shape[1]
    wt = jnp.transpose(w, (0, 2, 3, 1))                     # [co, ky, kx, ci]
    if cin_pad != ci:
        wt = jnp.pad(wt, ((0, 0), (0, 0), (0, 0), (0, cin_pad - ci)))
    return wt.reshape(w.shape[0], 9 * cin_pad)


def _group_mask(num_channels, groups):
    g = jnp.arange(num_channels) // (num_channels // groups)
    return (g[:, None] == g[None, :]).astype(jnp.float32)   # [C, C] block-diag ones


def _film_scale_bias(z, t, lin, gn_w, gn_b):
    """Fold z/t projections + GN affine into per-(batch, channel) scale/bias:
       z_s*(t_s*(xhat*gn_w + gn_b) + t_b) + z_b  ==  scale*xhat + bias."""
    (wzs, bzs), (wzb, bzb), (wts, bts), (wtb, btb) = lin
    z_s = z @ wzs + bzs
    z_b = z @ wzb + bzb
    t_s = t @ wts + bts
    t_b = t @ wtb + btb
    a = z_s * t_s
    scale = a * gn_w
    bias = a * gn_b + z_s * t_b + z_b
    return jnp.stack([scale, bias], axis=-1)                # [B, C, 2]


def unet_conv_forward(params, x_nchw, z, t, *, groups=8, eps=1e-5):
    """Full UNetConv forward.  x_nchw: [B,Cin,H,W], z: [B,latent], t: [B,time]."""
    x_nchw = x_nchw.astype(jnp.float32)
    B, cin, H, W = x_nchw.shape
    HW = H * W
    w1, w2 = params["w1"], params["w2"]
    C1, C2 = w1.shape[0], w2.shape[0]
    cin_pad = ((cin + 7) // 8) * 8      # sublane-align the per-tap channel blocks

    # NCHW -> [B, C, H*W] is a pure reshape (no transpose / extra HBM pass).
    x3 = x_nchw.reshape(B, cin, HW)
    if cin_pad != cin:
        x3 = jnp.pad(x3, ((0, 0), (0, cin_pad - cin), (0, 0)))

    w1m = _im2col_weight(w1, cin_pad)                        # [C1, 9*cin_pad]
    w2m = _im2col_weight(w2, C1)                             # [C2, 9*C1]
    m1 = _group_mask(C1, groups)
    m2 = _group_mask(C2, groups)
    colid = (jnp.arange(HW, dtype=jnp.int32) % W).reshape(1, HW)
    film1 = _film_scale_bias(z, t, params["lin1"], params["gn1_w"], params["gn1_b"])
    film2 = _film_scale_bias(z, t, params["lin2"], params["gn2_w"], params["gn2_b"])

    kernel = functools.partial(_unet_conv_kernel, H=H, W=W, groups=groups, eps=eps)

    def fixed(a):                        # grid-invariant, fully-resident operand
        zeros = (0,) * a.ndim
        return pl.BlockSpec(a.shape, lambda b: zeros)

    out = pl.pallas_call(
        kernel,
        out_shape=jax.ShapeDtypeStruct((B, C2, HW), jnp.float32),
        grid=(B,),
        in_specs=[
            fixed(colid),
            pl.BlockSpec((1, cin_pad, HW), lambda b: (b, 0, 0)),
            fixed(w1m), fixed(w2m), fixed(m1), fixed(m2),
            pl.BlockSpec((1, C1, 2), lambda b: (b, 0, 0)),
            pl.BlockSpec((1, C2, 2), lambda b: (b, 0, 0)),
        ],
        out_specs=pl.BlockSpec((1, C2, HW), lambda b: (b, 0, 0)),
        # Batch axis is embarrassingly parallel -> shards across v7x's 2 TCs.
        # TODO(synk): on single-TC chips (v5e/v6e) folding batch into one grid step
        #             (acc [C, B*HW]) would also shave the ~0.35us/step overhead.
        compiler_params=pltpu.CompilerParams(dimension_semantics=("parallel",)),
    )(colid, x3, w1m, w2m, m1, m2, film1, film2)
    return out.reshape(B, C2, H, W)


# ---------------------------------------------------------------------------
# Deterministic parameter init (synthetic; mirrors the PyTorch module's shapes)
# ---------------------------------------------------------------------------
def init_params(key, in_ch, int_ch, out_ch, latent_dim, time_dim):
    ks = jax.random.split(key, 14)

    def conv_w(k, co, ci):
        # PyTorch conv weight layout [co, ci, 3, 3].
        return jax.random.normal(k, (co, ci, 3, 3), jnp.float32) / jnp.sqrt(ci * 9.0)

    def linear(k, din, dout):
        k1, k2 = jax.random.split(k)
        lim = 1.0 / float(np.sqrt(din))
        Wm = jax.random.uniform(k1, (din, dout), jnp.float32, -lim, lim)  # stored as W^T
        b = jax.random.uniform(k2, (1, dout), jnp.float32, -lim, lim)
        return Wm, b

    return {
        "w1": conv_w(ks[0], int_ch, in_ch),
        "w2": conv_w(ks[1], out_ch, int_ch),
        "gn1_w": 1.0 + 0.1 * jax.random.normal(ks[2], (1, int_ch), jnp.float32),
        "gn1_b": 0.1 * jax.random.normal(ks[3], (1, int_ch), jnp.float32),
        "gn2_w": 1.0 + 0.1 * jax.random.normal(ks[4], (1, out_ch), jnp.float32),
        "gn2_b": 0.1 * jax.random.normal(ks[5], (1, out_ch), jnp.float32),
        "lin1": (linear(ks[6], latent_dim, int_ch), linear(ks[7], latent_dim, int_ch),
                 linear(ks[8], time_dim, int_ch), linear(ks[9], time_dim, int_ch)),
        "lin2": (linear(ks[10], latent_dim, out_ch), linear(ks[11], latent_dim, out_ch),
                 linear(ks[12], time_dim, out_ch), linear(ks[13], time_dim, out_ch)),
    }


# ---------------------------------------------------------------------------
# Pure-JAX reference (same math as the PyTorch module) for a sanity check.
# ---------------------------------------------------------------------------
def reference_forward(params, x_nchw, z, t, *, groups=8, eps=1e-5):
    B, cin, H, W = x_nchw.shape

    def conv(x, w):                      # x: [B,C,H,W], w: [co,ci,3,3], circular pad
        xp = jnp.pad(x, ((0, 0), (0, 0), (1, 1), (1, 1)), mode="wrap")
        out = jnp.zeros((B, w.shape[0], H, W), jnp.float32)
        for ky in range(3):
            for kx in range(3):
                out = out + jnp.einsum("bchw,dc->bdhw",
                                       xp[:, :, ky:ky + H, kx:kx + W], w[:, :, ky, kx])
        return out

    def gnorm(x, gw, gb):
        Bc, C, Hh, Ww = x.shape
        xg = x.reshape(Bc, groups, C // groups, Hh, Ww)
        m = xg.mean(axis=(2, 3, 4), keepdims=True)
        v = ((xg - m) ** 2).mean(axis=(2, 3, 4), keepdims=True)
        xn = ((xg - m) / jnp.sqrt(v + eps)).reshape(Bc, C, Hh, Ww)
        return xn * gw.reshape(1, C, 1, 1) + gb.reshape(1, C, 1, 1)

    def gelu_exact(x):
        return 0.5 * x * (1.0 + jax.scipy.special.erf(x / jnp.sqrt(2.0)))

    def lin(v, Wb):
        Wm, b = Wb
        return v @ Wm + b

    def adagn(h, gw, gb, lp):
        zs, zb, ts_, tb_ = lp
        g = gnorm(h, gw, gb)
        z_s = lin(z, zs)[:, :, None, None]
        z_b = lin(z, zb)[:, :, None, None]
        t_s = lin(t, ts_)[:, :, None, None]
        t_b = lin(t, tb_)[:, :, None, None]
        return z_s * (t_s * g + t_b) + z_b

    h = conv(x_nchw.astype(jnp.float32), params["w1"])
    h = gelu_exact(adagn(h, params["gn1_w"], params["gn1_b"], params["lin1"]))
    h = conv(h, params["w2"])
    h = adagn(h, params["gn2_w"], params["gn2_b"], params["lin2"])
    return h + gelu_exact(h)


if __name__ == "__main__":
    B, Cin, H, W = 2, 4, 16, 16
    Cint, Cout = 16, 16                  # must be divisible by num_groups=8
    latent_dim, time_dim = 8, 8

    key = jax.random.PRNGKey(0)
    kx, kz, kt, kp = jax.random.split(key, 4)
    x = jax.random.normal(kx, (B, Cin, H, W), jnp.float32)
    z = jax.random.normal(kz, (B, latent_dim), jnp.float32)
    t = jax.random.normal(kt, (B, time_dim), jnp.float32)
    params = init_params(kp, Cin, Cint, Cout, latent_dim, time_dim)

    out = jax.jit(unet_conv_forward)(params, x, z, t)
    out = jax.block_until_ready(out)
    assert out.shape == (B, Cout, H, W)

    ref = reference_forward(params, x, z, t)
    np.testing.assert_allclose(np.asarray(out), np.asarray(ref), rtol=2e-3, atol=2e-3)

    print("KERNEL_OK")
</pallas_src>

<mosaic_0001>
module attributes {stable_mosaic.version = 11 : i64} {
  func.func @_unet_conv_kernel(%arg0: i32, %arg1: memref<1x256xi32, #tpu.memory_space<vmem>>, %arg2: memref<1x8x256xf32, #tpu.memory_space<vmem>>, %arg3: memref<16x72xf32, #tpu.memory_space<vmem>>, %arg4: memref<16x144xf32, #tpu.memory_space<vmem>>, %arg5: memref<16x16xf32, #tpu.memory_space<vmem>>, %arg6: memref<16x16xf32, #tpu.memory_space<vmem>>, %arg7: memref<1x16x2xf32, #tpu.memory_space<vmem>>, %arg8: memref<1x16x2xf32, #tpu.memory_space<vmem>>, %arg9: memref<1x16x256xf32, #tpu.memory_space<vmem>>) attributes {dimension_semantics = [#tpu.dimension_semantics<parallel>], iteration_bounds = array<i64: 2>, scalar_prefetch = 0 : i64, scratch_operands = 0 : i64, tpu.core_type = #tpu.core_type<tc>, window_params = [{pipeline_mode = #tpu.pipeline_mode<synchronous>, transform_indices = @transform_0, window_bounds = array<i64: 1, 256>}, {transform_indices = @transform_1, window_bounds = array<i64: 1, 8, 256>}, {pipeline_mode = #tpu.pipeline_mode<synchronous>, transform_indices = @transform_2, window_bounds = array<i64: 16, 72>}, {pipeline_mode = #tpu.pipeline_mode<synchronous>, transform_indices = @transform_3, window_bounds = array<i64: 16, 144>}, {pipeline_mode = #tpu.pipeline_mode<synchronous>, transform_indices = @transform_4, window_bounds = array<i64: 16, 16>}, {pipeline_mode = #tpu.pipeline_mode<synchronous>, transform_indices = @transform_5, window_bounds = array<i64: 16, 16>}, {transform_indices = @transform_6, window_bounds = array<i64: 1, 16, 2>}, {transform_indices = @transform_7, window_bounds = array<i64: 1, 16, 2>}, {transform_indices = @transform_8, window_bounds = array<i64: 1, 16, 256>}]} {
    %c0 = arith.constant 0 : index
    %c0_0 = arith.constant 0 : index
    %0 = vector.load %arg1[%c0, %c0_0] : memref<1x256xi32, #tpu.memory_space<vmem>>, vector<1x256xi32>
    %c0_i32 = arith.constant 0 : i32
    %1 = vector.broadcast %c0_i32 : i32 to vector<1x256xi32>
    %2 = arith.cmpi eq, %0, %1 : vector<1x256xi32>
    %c15_i32 = arith.constant 15 : i32
    %3 = vector.broadcast %c15_i32 : i32 to vector<1x256xi32>
    %4 = arith.cmpi eq, %0, %3 : vector<1x256xi32>
    %c0_1 = arith.constant 0 : index
    %c0_2 = arith.constant 0 : index
    %c0_3 = arith.constant 0 : index
    %5 = vector.load %arg2[%c0_1, %c0_2, %c0_3] : memref<1x8x256xf32, #tpu.memory_space<vmem>>, vector<1x8x256xf32>
    %6 = vector.shape_cast %5 : vector<1x8x256xf32> to vector<8x256xf32>
    %c1_i32 = arith.constant 1 : i32
    %7 = tpu.dynamic_rotate %6 by %c1_i32 dim 1 : vector<8x256xf32>, i32 -> vector<8x256xf32>
    %c241_i32 = arith.constant 241 : i32
    %8 = tpu.dynamic_rotate %6 by %c241_i32 dim 1 : vector<8x256xf32>, i32 -> vector<8x256xf32>
    %9 = vector.shape_cast %2 : vector<1x256xi1> to vector<1x256xi1>
    %10 = vector.broadcast %9 : vector<1x256xi1> to vector<8x256xi1>
    %11 = arith.select %10, %8, %7 : vector<8x256xi1>, vector<8x256xf32>
    %c255_i32 = arith.constant 255 : i32
    %12 = tpu.dynamic_rotate %6 by %c255_i32 dim 1 : vector<8x256xf32>, i32 -> vector<8x256xf32>
    %c15_i32_4 = arith.constant 15 : i32
    %13 = tpu.dynamic_rotate %6 by %c15_i32_4 dim 1 : vector<8x256xf32>, i32 -> vector<8x256xf32>
    %14 = vector.shape_cast %4 : vector<1x256xi1> to vector<1x256xi1>
    %15 = vector.broadcast %14 : vector<1x256xi1> to vector<8x256xi1>
    %16 = arith.select %15, %13, %12 : vector<8x256xi1>, vector<8x256xf32>
    %c16_i32 = arith.constant 16 : i32
    %17 = tpu.dynamic_rotate %11 by %c16_i32 dim 1 : vector<8x256xf32>, i32 -> vector<8x256xf32>
    %c16_i32_5 = arith.constant 16 : i32
    %18 = tpu.dynamic_rotate %6 by %c16_i32_5 dim 1 : vector<8x256xf32>, i32 -> vector<8x256xf32>
    %c16_i32_6 = arith.constant 16 : i32
    %19 = tpu.dynamic_rotate %16 by %c16_i32_6 dim 1 : vector<8x256xf32>, i32 -> vector<8x256xf32>
    %c240_i32 = arith.constant 240 : i32
    %20 = tpu.dynamic_rotate %11 by %c240_i32 dim 1 : vector<8x256xf32>, i32 -> vector<8x256xf32>
    %c240_i32_7 = arith.constant 240 : i32
    %21 = tpu.dynamic_rotate %6 by %c240_i32_7 dim 1 : vector<8x256xf32>, i32 -> vector<8x256xf32>
    %c240_i32_8 = arith.constant 240 : i32
    %22 = tpu.dynamic_rotate %16 by %c240_i32_8 dim 1 : vector<8x256xf32>, i32 -> vector<8x256xf32>
    %23 = tpu.concatenate %17, %18, %19, %11, %6, %16, %20, %21, %22 in 0 : vector<8x256xf32>, vector<8x256xf32>, vector<8x256xf32>, vector<8x256xf32>, vector<8x256xf32>, vector<8x256xf32>, vector<8x256xf32>, vector<8x256xf32>, vector<8x256xf32> -> vector<72x256xf32>
    %c0_9 = arith.constant 0 : index
    %c0_10 = arith.constant 0 : index
    %24 = vector.load %arg3[%c0_9, %c0_10] : memref<16x72xf32, #tpu.memory_space<vmem>>, vector<16x72xf32>
    %cst = arith.constant dense<0.000000e+00> : vector<16x256xf32>
    %25 = tpu.matmul %24, %23, %cst {dimension_numbers = #tpu.dot_dimension_numbers<[1], [0], [0], [1], [0, 0, 1, 1], [], []>} : vector<16x72xf32>, vector<72x256xf32>, vector<16x256xf32> -> vector<16x256xf32>
    %cst_11 = arith.constant dense<0.000000e+00> : vector<16xf32>
    %26 = vector.multi_reduction <add>, %25, %cst_11 [1] : vector<16x256xf32> to vector<16xf32>
    %27 = vector.shape_cast %26 : vector<16xf32> to vector<16x1xf32>
    %c0_12 = arith.constant 0 : index
    %c0_13 = arith.constant 0 : index
    %28 = vector.load %arg5[%c0_12, %c0_13] : memref<16x16xf32, #tpu.memory_space<vmem>>, vector<16x16xf32>
    %cst_14 = arith.constant dense<0.000000e+00> : vector<16x1xf32>
    %29 = tpu.matmul %28, %27, %cst_14 {dimension_numbers = #tpu.dot_dimension_numbers<[1], [0], [0], [1], [0, 0, 1, 1], [], []>} : vector<16x16xf32>, vector<16x1xf32>, vector<16x1xf32> -> vector<16x1xf32>
    %cst_15 = arith.constant 0.001953125 : f32
    %30 = vector.broadcast %cst_15 : f32 to vector<16x1xf32>
    %31 = arith.mulf %29, %30 : vector<16x1xf32>
    %32 = vector.broadcast %31 : vector<16x1xf32> to vector<16x256xf32>
    %33 = arith.subf %25, %32 : vector<16x256xf32>
    %34 = arith.mulf %33, %33 : vector<16x256xf32>
    %cst_16 = arith.constant dense<0.000000e+00> : vector<16xf32>
    %35 = vector.multi_reduction <add>, %34, %cst_16 [1] : vector<16x256xf32> to vector<16xf32>
    %36 = vector.shape_cast %35 : vector<16xf32> to vector<16x1xf32>
    %c0_17 = arith.constant 0 : index
    %c0_18 = arith.constant 0 : index
    %37 = vector.load %arg5[%c0_17, %c0_18] : memref<16x16xf32, #tpu.memory_space<vmem>>, vector<16x16xf32>
    %cst_19 = arith.constant dense<0.000000e+00> : vector<16x1xf32>
    %38 = tpu.matmul %37, %36, %cst_19 {dimension_numbers = #tpu.dot_dimension_numbers<[1], [0], [0], [1], [0, 0, 1, 1], [], []>} : vector<16x16xf32>, vector<16x1xf32>, vector<16x1xf32> -> vector<16x1xf32>
    %cst_20 = arith.constant 0.001953125 : f32
    %39 = vector.broadcast %cst_20 : f32 to vector<16x1xf32>
    %40 = arith.mulf %38, %39 : vector<16x1xf32>
    %cst_21 = arith.constant 9.99999974E-6 : f32
    %41 = vector.broadcast %cst_21 : f32 to vector<16x1xf32>
    %42 = arith.addf %40, %41 : vector<16x1xf32>
    %43 = math.rsqrt %42 : vector<16x1xf32>
    %c0_22 = arith.constant 0 : index
    %c0_23 = arith.constant 0 : index
    %c0_24 = arith.constant 0 : index
    %44 = vector.load %arg7[%c0_22, %c0_23, %c0_24] : memref<1x16x2xf32, #tpu.memory_space<vmem>>, vector<1x16x2xf32>
    %45 = vector.shape_cast %44 : vector<1x16x2xf32> to vector<16x2xf32>
    %46 = vector.extract_strided_slice %45 {offsets = [0, 0], sizes = [16, 1], strides = [1, 1]} : vector<16x2xf32> to vector<16x1xf32>
    %47 = vector.extract_strided_slice %45 {offsets = [0, 1], sizes = [16, 1], strides = [1, 1]} : vector<16x2xf32> to vector<16x1xf32>
    %48 = vector.broadcast %43 : vector<16x1xf32> to vector<16x256xf32>
    %49 = arith.mulf %33, %48 : vector<16x256xf32>
    %50 = vector.broadcast %46 : vector<16x1xf32> to vector<16x256xf32>
    %51 = arith.mulf %50, %49 : vector<16x256xf32>
    %52 = vector.broadcast %47 : vector<16x1xf32> to vector<16x256xf32>
    %53 = arith.addf %51, %52 : vector<16x256xf32>
    %cst_25 = arith.constant 5.000000e-01 : f32
    %54 = vector.broadcast %cst_25 : f32 to vector<16x256xf32>
    %55 = arith.mulf %54, %53 : vector<16x256xf32>
    %cst_26 = arith.constant 0.707106769 : f32
    %56 = vector.broadcast %cst_26 : f32 to vector<16x256xf32>
    %57 = arith.mulf %53, %56 : vector<16x256xf32>
    %58 = math.absf %57 : vector<16x256xf32>
    %cst_27 = arith.constant 0.327591091 : f32
    %59 = vector.broadcast %cst_27 : f32 to vector<16x256xf32>
    %60 = arith.mulf %59, %58 : vector<16x256xf32>
    %cst_28 = arith.constant 1.000000e+00 : f32
    %61 = vector.broadcast %cst_28 : f32 to vector<16x256xf32>
    %62 = arith.addf %61, %60 : vector<16x256xf32>
    %cst_29 = arith.constant 1.000000e+00 : f32
    %63 = vector.broadcast %cst_29 : f32 to vector<16x256xf32>
    %64 = arith.divf %63, %62 : vector<16x256xf32>
    %cst_30 = arith.constant 1.06140542 : f32
    %65 = vector.broadcast %cst_30 : f32 to vector<16x256xf32>
    %66 = arith.mulf %65, %64 : vector<16x256xf32>
    %cst_31 = arith.constant -1.45315206 : f32
    %67 = vector.broadcast %cst_31 : f32 to vector<16x256xf32>
    %68 = arith.addf %66, %67 : vector<16x256xf32>
    %69 = arith.mulf %68, %64 : vector<16x256xf32>
    %cst_32 = arith.constant 1.42141378 : f32
    %70 = vector.broadcast %cst_32 : f32 to vector<16x256xf32>
    %71 = arith.addf %69, %70 : vector<16x256xf32>
    %72 = arith.mulf %71, %64 : vector<16x256xf32>
    %cst_33 = arith.constant -0.284496725 : f32
    %73 = vector.broadcast %cst_33 : f32 to vector<16x256xf32>
    %74 = arith.addf %72, %73 : vector<16x256xf32>
    %75 = arith.mulf %74, %64 : vector<16x256xf32>
    %cst_34 = arith.constant 0.254829586 : f32
    %76 = vector.broadcast %cst_34 : f32 to vector<16x256xf32>
    %77 = arith.addf %75, %76 : vector<16x256xf32>
    %78 = arith.mulf %77, %64 : vector<16x256xf32>
    %cst_35 = arith.constant 0.000000e+00 : f32
    %79 = vector.broadcast %cst_35 : f32 to vector<16x256xf32>
    %80 = arith.subf %79, %58 : vector<16x256xf32>
    %81 = arith.mulf %80, %58 : vector<16x256xf32>
    %82 = math.exp %81 : vector<16x256xf32>
    %83 = arith.mulf %78, %82 : vector<16x256xf32>
    %cst_36 = arith.constant 1.000000e+00 : f32
    %84 = vector.broadcast %cst_36 : f32 to vector<16x256xf32>
    %85 = arith.subf %84, %83 : vector<16x256xf32>
    %cst_37 = arith.constant 0.000000e+00 : f32
    %86 = vector.broadcast %cst_37 : f32 to vector<16x256xf32>
    %87 = arith.cmpf oge, %57, %86 : vector<16x256xf32>
    %cst_38 = arith.constant 0.000000e+00 : f32
    %88 = vector.broadcast %cst_38 : f32 to vector<16x256xf32>
    %89 = arith.subf %88, %85 : vector<16x256xf32>
    %90 = arith.select %87, %85, %89 : vector<16x256xi1>, vector<16x256xf32>
    %cst_39 = arith.constant 1.000000e+00 : f32
    %91 = vector.broadcast %cst_39 : f32 to vector<16x256xf32>
    %92 = arith.addf %91, %90 : vector<16x256xf32>
    %93 = arith.mulf %55, %92 : vector<16x256xf32>
    %c1_i32_40 = arith.constant 1 : i32
    %94 = tpu.dynamic_rotate %93 by %c1_i32_40 dim 1 : vector<16x256xf32>, i32 -> vector<16x256xf32>
    %c241_i32_41 = arith.constant 241 : i32
    %95 = tpu.dynamic_rotate %93 by %c241_i32_41 dim 1 : vector<16x256xf32>, i32 -> vector<16x256xf32>
    %96 = vector.shape_cast %2 : vector<1x256xi1> to vector<1x256xi1>
    %97 = vector.broadcast %96 : vector<1x256xi1> to vector<16x256xi1>
    %98 = arith.select %97, %95, %94 : vector<16x256xi1>, vector<16x256xf32>
    %c255_i32_42 = arith.constant 255 : i32
    %99 = tpu.dynamic_rotate %93 by %c255_i32_42 dim 1 : vector<16x256xf32>, i32 -> vector<16x256xf32>
    %c15_i32_43 = arith.constant 15 : i32
    %100 = tpu.dynamic_rotate %93 by %c15_i32_43 dim 1 : vector<16x256xf32>, i32 -> vector<16x256xf32>
    %101 = vector.shape_cast %4 : vector<1x256xi1> to vector<1x256xi1>
    %102 = vector.broadcast %101 : vector<1x256xi1> to vector<16x256xi1>
    %103 = arith.select %102, %100, %99 : vector<16x256xi1>, vector<16x256xf32>
    %c16_i32_44 = arith.constant 16 : i32
    %104 = tpu.dynamic_rotate %98 by %c16_i32_44 dim 1 : vector<16x256xf32>, i32 -> vector<16x256xf32>
    %c16_i32_45 = arith.constant 16 : i32
    %105 = tpu.dynamic_rotate %93 by %c16_i32_45 dim 1 : vector<16x256xf32>, i32 -> vector<16x256xf32>
    %c16_i32_46 = arith.constant 16 : i32
    %106 = tpu.dynamic_rotate %103 by %c16_i32_46 dim 1 : vector<16x256xf32>, i32 -> vector<16x256xf32>
    %c240_i32_47 = arith.constant 240 : i32
    %107 = tpu.dynamic_rotate %98 by %c240_i32_47 dim 1 : vector<16x256xf32>, i32 -> vector<16x256xf32>
    %c240_i32_48 = arith.constant 240 : i32
    %108 = tpu.dynamic_rotate %93 by %c240_i32_48 dim 1 : vector<16x256xf32>, i32 -> vector<16x256xf32>
    %c240_i32_49 = arith.constant 240 : i32
    %109 = tpu.dynamic_rotate %103 by %c240_i32_49 dim 1 : vector<16x256xf32>, i32 -> vector<16x256xf32>
    %110 = tpu.concatenate %104, %105, %106, %98, %93, %103, %107, %108, %109 in 0 : vector<16x256xf32>, vector<16x256xf32>, vector<16x256xf32>, vector<16x256xf32>, vector<16x256xf32>, vector<16x256xf32>, vector<16x256xf32>, vector<16x256xf32>, vector<16x256xf32> -> vector<144x256xf32>
    %c0_50 = arith.constant 0 : index
    %c0_51 = arith.constant 0 : index
    %111 = vector.load %arg4[%c0_50, %c0_51] : memref<16x144xf32, #tpu.memory_space<vmem>>, vector<16x144xf32>
    %cst_52 = arith.constant dense<0.000000e+00> : vector<16x256xf32>
    %112 = tpu.matmul %111, %110, %cst_52 {dimension_numbers = #tpu.dot_dimension_numbers<[1], [0], [0], [1], [0, 0, 1, 1], [], []>} : vector<16x144xf32>, vector<144x256xf32>, vector<16x256xf32> -> vector<16x256xf32>
    %cst_53 = arith.constant dense<0.000000e+00> : vector<16xf32>
    %113 = vector.multi_reduction <add>, %112, %cst_53 [1] : vector<16x256xf32> to vector<16xf32>
    %114 = vector.shape_cast %113 : vector<16xf32> to vector<16x1xf32>
    %c0_54 = arith.constant 0 : index
    %c0_55 = arith.constant 0 : index
    %115 = vector.load %arg6[%c0_54, %c0_55] : memref<16x16xf32, #tpu.memory_space<vmem>>, vector<16x16xf32>
    %cst_56 = arith.constant dense<0.000000e+00> : vector<16x1xf32>
    %116 = tpu.matmul %115, %114, %cst_56 {dimension_numbers = #tpu.dot_dimension_numbers<[1], [0], [0], [1], [0, 0, 1, 1], [], []>} : vector<16x16xf32>, vector<16x1xf32>, vector<16x1xf32> -> vector<16x1xf32>
    %cst_57 = arith.constant 0.001953125 : f32
    %117 = vector.broadcast %cst_57 : f32 to vector<16x1xf32>
    %118 = arith.mulf %116, %117 : vector<16x1xf32>
    %119 = vector.broadcast %118 : vector<16x1xf32> to vector<16x256xf32>
    %120 = arith.subf %112, %119 : vector<16x256xf32>
    %121 = arith.mulf %120, %120 : vector<16x256xf32>
    %cst_58 = arith.constant dense<0.000000e+00> : vector<16xf32>
    %122 = vector.multi_reduction <add>, %121, %cst_58 [1] : vector<16x256xf32> to vector<16xf32>
    %123 = vector.shape_cast %122 : vector<16xf32> to vector<16x1xf32>
    %c0_59 = arith.constant 0 : index
    %c0_60 = arith.constant 0 : index
    %124 = vector.load %arg6[%c0_59, %c0_60] : memref<16x16xf32, #tpu.memory_space<vmem>>, vector<16x16xf32>
    %cst_61 = arith.constant dense<0.000000e+00> : vector<16x1xf32>
    %125 = tpu.matmul %124, %123, %cst_61 {dimension_numbers = #tpu.dot_dimension_numbers<[1], [0], [0], [1], [0, 0, 1, 1], [], []>} : vector<16x16xf32>, vector<16x1xf32>, vector<16x1xf32> -> vector<16x1xf32>
    %cst_62 = arith.constant 0.001953125 : f32
    %126 = vector.broadcast %cst_62 : f32 to vector<16x1xf32>
    %127 = arith.mulf %125, %126 : vector<16x1xf32>
    %cst_63 = arith.constant 9.99999974E-6 : f32
    %128 = vector.broadcast %cst_63 : f32 to vector<16x1xf32>
    %129 = arith.addf %127, %128 : vector<16x1xf32>
    %130 = math.rsqrt %129 : vector<16x1xf32>
    %c0_64 = arith.constant 0 : index
    %c0_65 = arith.constant 0 : index
    %c0_66 = arith.constant 0 : index
    %131 = vector.load %arg8[%c0_64, %c0_65, %c0_66] : memref<1x16x2xf32, #tpu.memory_space<vmem>>, vector<1x16x2xf32>
    %132 = vector.shape_cast %131 : vector<1x16x2xf32> to vector<16x2xf32>
    %133 = vector.extract_strided_slice %132 {offsets = [0, 0], sizes = [16, 1], strides = [1, 1]} : vector<16x2xf32> to vector<16x1xf32>
    %134 = vector.extract_strided_slice %132 {offsets = [0, 1], sizes = [16, 1], strides = [1, 1]} : vector<16x2xf32> to vector<16x1xf32>
    %135 = vector.broadcast %130 : vector<16x1xf32> to vector<16x256xf32>
    %136 = arith.mulf %120, %135 : vector<16x256xf32>
    %137 = vector.broadcast %133 : vector<16x1xf32> to vector<16x256xf32>
    %138 = arith.mulf %137, %136 : vector<16x256xf32>
    %139 = vector.broadcast %134 : vector<16x1xf32> to vector<16x256xf32>
    %140 = arith.addf %138, %139 : vector<16x256xf32>
    %cst_67 = arith.constant 5.000000e-01 : f32
    %141 = vector.broadcast %cst_67 : f32 to vector<16x256xf32>
    %142 = arith.mulf %141, %140 : vector<16x256xf32>
    %cst_68 = arith.constant 0.707106769 : f32
    %143 = vector.broadcast %cst_68 : f32 to vector<16x256xf32>
    %144 = arith.mulf %140, %143 : vector<16x256xf32>
    %145 = math.absf %144 : vector<16x256xf32>
    %cst_69 = arith.constant 0.327591091 : f32
    %146 = vector.broadcast %cst_69 : f32 to vector<16x256xf32>
    %147 = arith.mulf %146, %145 : vector<16x256xf32>
    %cst_70 = arith.constant 1.000000e+00 : f32
    %148 = vector.broadcast %cst_70 : f32 to vector<16x256xf32>
    %149 = arith.addf %148, %147 : vector<16x256xf32>
    %cst_71 = arith.constant 1.000000e+00 : f32
    %150 = vector.broadcast %cst_71 : f32 to vector<16x256xf32>
    %151 = arith.divf %150, %149 : vector<16x256xf32>
    %cst_72 = arith.constant 1.06140542 : f32
    %152 = vector.broadcast %cst_72 : f32 to vector<16x256xf32>
    %153 = arith.mulf %152, %151 : vector<16x256xf32>
    %cst_73 = arith.constant -1.45315206 : f32
    %154 = vector.broadcast %cst_73 : f32 to vector<16x256xf32>
    %155 = arith.addf %153, %154 : vector<16x256xf32>
    %156 = arith.mulf %155, %151 : vector<16x256xf32>
    %cst_74 = arith.constant 1.42141378 : f32
    %157 = vector.broadcast %cst_74 : f32 to vector<16x256xf32>
    %158 = arith.addf %156, %157 : vector<16x256xf32>
    %159 = arith.mulf %158, %151 : vector<16x256xf32>
    %cst_75 = arith.constant -0.284496725 : f32
    %160 = vector.broadcast %cst_75 : f32 to vector<16x256xf32>
    %161 = arith.addf %159, %160 : vector<16x256xf32>
    %162 = arith.mulf %161, %151 : vector<16x256xf32>
    %cst_76 = arith.constant 0.254829586 : f32
    %163 = vector.broadcast %cst_76 : f32 to vector<16x256xf32>
    %164 = arith.addf %162, %163 : vector<16x256xf32>
    %165 = arith.mulf %164, %151 : vector<16x256xf32>
    %cst_77 = arith.constant 0.000000e+00 : f32
    %166 = vector.broadcast %cst_77 : f32 to vector<16x256xf32>
    %167 = arith.subf %166, %145 : vector<16x256xf32>
    %168 = arith.mulf %167, %145 : vector<16x256xf32>
    %169 = math.exp %168 : vector<16x256xf32>
    %170 = arith.mulf %165, %169 : vector<16x256xf32>
    %cst_78 = arith.constant 1.000000e+00 : f32
    %171 = vector.broadcast %cst_78 : f32 to vector<16x256xf32>
    %172 = arith.subf %171, %170 : vector<16x256xf32>
    %cst_79 = arith.constant 0.000000e+00 : f32
    %173 = vector.broadcast %cst_79 : f32 to vector<16x256xf32>
    %174 = arith.cmpf oge, %144, %173 : vector<16x256xf32>
    %cst_80 = arith.constant 0.000000e+00 : f32
    %175 = vector.broadcast %cst_80 : f32 to vector<16x256xf32>
    %176 = arith.subf %175, %172 : vector<16x256xf32>
    %177 = arith.select %174, %172, %176 : vector<16x256xi1>, vector<16x256xf32>
    %cst_81 = arith.constant 1.000000e+00 : f32
    %178 = vector.broadcast %cst_81 : f32 to vector<16x256xf32>
    %179 = arith.addf %178, %177 : vector<16x256xf32>
    %180 = arith.mulf %142, %179 : vector<16x256xf32>
    %181 = arith.addf %140, %180 : vector<16x256xf32>
    %c0_82 = arith.constant 0 : index
    %c0_83 = arith.constant 0 : index
    %c0_84 = arith.constant 0 : index
    %182 = vector.load %arg9[%c0_82, %c0_83, %c0_84] : memref<1x16x256xf32, #tpu.memory_space<vmem>>, vector<1x16x256xf32>
    %183 = vector.shape_cast %182 : vector<1x16x256xf32> to vector<16x256xf32>
    %184 = vector.shape_cast %181 : vector<16x256xf32> to vector<1x16x256xf32>
    tpu.vector_store %arg9[%c0_82, %c0_83, %c0_84], %184 {strides = array<i32>} : memref<1x16x256xf32, #tpu.memory_space<vmem>>, vector<1x16x256xf32>,
    return
  }
  func.func @transform_0(%arg0: i32) -> (i32, i32) {
    %c0_i32 = arith.constant 0 : i32
    %c0_i32_0 = arith.constant 0 : i32
    %c0_i32_1 = arith.constant 0 : i32
    return %c0_i32, %c0_i32_0 : i32, i32
  }
  func.func @transform_1(%arg0: i32) -> (i32, i32, i32) {
    %c0_i32 = arith.constant 0 : i32
    %c0_i32_0 = arith.constant 0 : i32
    %c0_i32_1 = arith.constant 0 : i32
    return %arg0, %c0_i32, %c0_i32_0 : i32, i32, i32
  }
  func.func @transform_2(%arg0: i32) -> (i32, i32) {
    %c0_i32 = arith.constant 0 : i32
    %c0_i32_0 = arith.constant 0 : i32
    %c0_i32_1 = arith.constant 0 : i32
    return %c0_i32, %c0_i32_0 : i32, i32
  }
  func.func @transform_3(%arg0: i32) -> (i32, i32) {
    %c0_i32 = arith.constant 0 : i32
    %c0_i32_0 = arith.constant 0 : i32
    %c0_i32_1 = arith.constant 0 : i32
    return %c0_i32, %c0_i32_0 : i32, i32
  }
  func.func @transform_4(%arg0: i32) -> (i32, i32) {
    %c0_i32 = arith.constant 0 : i32
    %c0_i32_0 = arith.constant 0 : i32
    %c0_i32_1 = arith.constant 0 : i32
    return %c0_i32, %c0_i32_0 : i32, i32
  }
  func.func @transform_5(%arg0: i32) -> (i32, i32) {
    %c0_i32 = arith.constant 0 : i32
    %c0_i32_0 = arith.constant 0 : i32
    %c0_i32_1 = arith.constant 0 : i32
    return %c0_i32, %c0_i32_0 : i32, i32
  }
  func.func @transform_6(%arg0: i32) -> (i32, i32, i32) {
    %c0_i32 = arith.constant 0 : i32
    %c0_i32_0 = arith.constant 0 : i32
    %c0_i32_1 = arith.constant 0 : i32
    return %arg0, %c0_i32, %c0_i32_0 : i32, i32, i32
  }
  func.func @transform_7(%arg0: i32) -> (i32, i32, i32) {
    %c0_i32 = arith.constant 0 : i32
    %c0_i32_0 = arith.constant 0 : i32
    %c0_i32_1 = arith.constant 0 : i32
    return %arg0, %c0_i32, %c0_i32_0 : i32, i32, i32
  }
  func.func @transform_8(%arg0: i32) -> (i32, i32, i32) {
    %c0_i32 = arith.constant 0 : i32
    %c0_i32_0 = arith.constant 0 : i32
    %c0_i32_1 = arith.constant 0 : i32
    return %arg0, %c0_i32, %c0_i32_0 : i32, i32, i32
  }
}

</mosaic_0001>

<bundles_post_ra>
// kernel: unet_conv_forward.1
= control target key start
LH: loop header
LB: loop body
LE: loop exit
PB: predicated region body
PF: predicated region fallthrough
CT: control target
= control target key end

     0   :  { %s1931_s27 = smov 0   ;;  %s2375_s0 = inlined_call_operand.vmem [shape: s32[1,256], index: 0, kind: input, shape index: {}]   ;;  %s2376_s1 = inlined_call_operand.vmem [shape: f32[2,8,256], index: 1, kind: input, shape index: {}]   ;;  %s2377_s2 = inlined_call_operand.vmem [shape: f32[16,72], index: 2, kind: input, shape index: {}]   ;;  %s2378_s3 = inlined_call_operand.vmem [shape: f32[16,144], index: 3, kind: input, shape index: {}]   ;;  %s2379_s4 = inlined_call_operand.vmem [shape: f32[16,16], index: 4, kind: input, shape index: {}, may-alias: {4,5}]   ;;  %s2380_s5 = inlined_call_operand.vmem [shape: f32[16,16], index: 5, kind: input, shape index: {}, may-alias: {4,5}]   ;;  %s2381_s6 = inlined_call_operand.vmem [shape: f32[2,16,2], index: 6, kind: input, shape index: {}]   ;;  %s2382_s7 = inlined_call_operand.vmem [shape: f32[2,16,2], index: 7, kind: input, shape index: {}]   ;;  %s2383_s8 = inlined_call_operand.vmem [shape: f32[2,16,256], index: 8, kind: output, shape index: {}]  }
   0x1 LB: > { %s1526_s28 = sadd.s32 4294967295, %s1875_s27   ;;  %p1530_p0 = scmp.ge.s32.totalorder %s1875_s27, 1  ;;  %s1875_s27 = sphi %s1931_s27, %s18_s27  }
   0x2   : > { %p282_p1 = scmp.lt.s32.totalorder %s1875_s27, 3 }
   0x4   : > { %p283_p2 = pnand %p1530_p0, %p282_p1 }
   0x5   : > { %p326_p3 = scmp.lt.s32.totalorder (!%p283_p2), %s1526_s28, 1  ;;  %v1877_v0 = vmov (!%p283_p2), 0   ;;  %s1878_s11 = smov (!%p283_p2), 127   ;;  %v355_v4 = vlaneseq (!%p283_p2)  ;;  %v346_v5 = vld [vmem:[%s2375_s0] sm:$0x3] (!%p283_p2)  ;;  %v1884_v40 = vmov (!%p283_p2), 0.0  }
   0x6   : > { %286 = sbr.rel (%p283_p2) target bundleno = 3129 (0xc39), region = 52  ;;  %1722 = vset.pattern.permute.xlu1 (!%p283_p2), %v1877_v0  ;;  %1721 = vset.pattern.permute.xlu0 (!%p283_p2), %v1877_v0  ;;  %s1879_s12 = smov (!%p283_p2), 1   ;;  %vm347_vm0 = vcmp.eq.s32.totalorder (!%p283_p2), %v346_v5, 0  ;;  %vm348_vm1 = vcmp.eq.s32.totalorder (!%p283_p2), %v346_v5, 15  ;;  %vm447_vm12 = vcmask (!%p283_p2), 588800   ;;  %vm539_vm13 = vcmask (!%p283_p2), 130048  }
   0x7   : > { %s1880_s13 = smov (!%p283_p2), 113   ;;  %s1881_s14 = smov (!%p283_p2), 15   ;;  %v369_v6 = vshrl.u32 (!%p283_p2), %v355_v4, 7  ;;  %v367_v10 = vsel (!%p283_p2), %vm347_vm0, 1, %v1877_v0  ;;  %v394_v11 = vsel (!%p283_p2), %vm348_vm1, 1, %v1877_v0  ;;  %v1972_v12 = vand.u32 (!%p283_p2), 127, %v355_v4  ;;  %518 = vmatprep.mubr.f32.mxu0 (!%p283_p2), %v1884_v40 }
   0x8   : > { %s1882_s15 = smov (!%p283_p2), 16   ;;  %s1883_s18 = smov (!%p283_p2), 112  }
   0x9   : > { %v374_v7 = vsub.s32 (!%p283_p2), 1, %v369_v6  ;;  %v370_v8 = vsub.s32 (!%p283_p2), 0, %v369_v6  ;;  %vm357_vm2 = vcmp.lt.s32.totalorder (!%p283_p2), %v1972_v12, 1  ;;  %vm384_vm3 = vcmp.lt.s32.totalorder (!%p283_p2), %v1972_v12, 127 }
   0xa   : > { %vm364_vm4 = vcmp.lt.s32.totalorder (!%p283_p2), %v1972_v12, 113  ;;  %vm391_vm7 = vcmp.lt.s32.totalorder (!%p283_p2), %v1972_v12, 15  ;;  %vm411_vm10 = vcmp.lt.s32.totalorder (!%p283_p2), %v1972_v12, 16  ;;  %vm430_vm11 = vcmp.lt.s32.totalorder (!%p283_p2), %v1972_v12, 112  ;;  %v1008_v12 = vld [vmem:[%s2378_s3 + $0x10] sm:$0xff] (!%p283_p2) }
   0xb   : > { %v1974_v14 = vrot.slane (!%p283_p2), %v367_v10, %v370_v8  ;;  %v1976_v15 = vrot.slane (!%p283_p2), %v367_v10, %v374_v7  ;;  %v1978_v17 = vrot.slane (!%p283_p2), %v394_v11, %v374_v7  ;;  %v1980_v18 = vrot.slane (!%p283_p2), %v394_v11, %v370_v8 }
   0xd   : > { %s2385_s28 = smov (!%p326_p3, %s1526_s28), 1  ;;  %vm376_vm5 = vcmp.eq.s32.totalorder %v1974_v14, 1  ;;  %vm377_vm6 = vcmp.eq.s32.totalorder %v1976_v15, 1  ;;  %vm404_vm8 = vcmp.eq.s32.totalorder %v1978_v17, 1  ;;  %vm403_vm9 = vcmp.eq.s32.totalorder %v1980_v18, 1  ;;  %v1007_v17 = vld [vmem:[%s2378_s3 + $0x8] sm:$0xff] }
   0xe   : > { %s1944_s29 = sshll.u32 %s2385_s28, 4  ;;  %1545 = vmatprep.mubr.msk.f32.mxu1 %vm539_vm13, %v1007_v17 }
   0xf   : > { %s330_s10 = scalar_lea.vmem %s2376_s1, %s1944_s29  ;;  %s340_s25 = scalar_lea.vmem %s2382_s7, %s1944_s29 }
  0x10   : > { %v1950_v1 = vld [vmem:[%s330_s10] sm:$0xff]  ;;  %v1952_v2 = vld [vmem:[%s330_s10 + $0x8] sm:$0xff]  ;;  %s335_s10 = scalar_lea.vmem %s2381_s6, %s1944_s29  ;;  %s1556_s29 = sshll.u32 %s2385_s28, 5 }
  0x11   : > { %380 = vrot.lane.b32.xlu1 %v1950_v1, %s1878_s11  ;;  %v1686_v3 = vpack.i.bf16 %v1952_v2, %v1950_v1  ;;  %s345_s9 = scalar_lea.vmem %s2383_s8, %s1556_s29 }
  0x13   : > { %1687 = vrot.lane.b32.xlu0 %v1686_v3, %s1879_s12 }
  0x15   : > { %382 = vrot.lane.b32.xlu1 %v1952_v2, %s1878_s11 }
  0x17   : > { %1692 = vrot.lane.b32.xlu0 %v1686_v3, %s1880_s13 }
  0x19   : > { %389 = vrot.lane.b32.xlu1 %v1952_v2, %s1881_s14 }
  0x1b   : > { %387 = vrot.lane.b32.xlu0 %v1950_v1, %s1881_s14 }
  0x1d   : > { %1697 = vrot.lane.b32.xlu1 %v1686_v3, %s1882_s15 }
  0x83   : > { %v381_v9 = vpop.permute.xlu1 %380 }
  0x85   : > { %v1688_v13 = vpop.permute.xlu0 %1687 }
  0x86   : > { %v1690_v19 = vunpack.i.h.bf16 %v1688_v13  ;;  %v1689_v20 = vunpack.i.l.bf16 %v1688_v13 }
  0x87   : > { %v383_v16 = vpop.permute.xlu1 %382 }
  0x88   : > { %v358_v25 = vsel %vm357_vm2, %v1689_v20, %v1690_v19  ;;  %v359_v26 = vsel %vm357_vm2, %v1690_v19, %v1689_v20  ;;  %v385_v29 = vsel %vm384_vm3, %v381_v9, %v383_v16  ;;  %v386_v30 = vsel %vm384_vm3, %v383_v16, %v381_v9 }
  0x89   : > { %v1693_v21 = vpop.permute.xlu0 %1692 }
  0x8a   : > { %v1695_v22 = vunpack.i.h.bf16 %v1693_v21  ;;  %v1694_v23 = vunpack.i.l.bf16 %v1693_v21  ;;  %v446_v21 = vld [vmem:[%s2377_s2 + $0x8] sm:$0xff] }
  0x8b   : > { %v390_v24 = vpop.permute.xlu1 %389 }
  0x8c   : > { %v365_v27 = vsel %vm364_vm4, %v1694_v23, %v1695_v22  ;;  %v366_v28 = vsel %vm364_vm4, %v1695_v22, %v1694_v23 }
  0x8d   : > { %v388_v31 = vpop.permute.xlu0 %387  ;;  %v378_v32 = vsel %vm376_vm5, %v365_v27, %v359_v26  ;;  %v379_v33 = vsel %vm377_vm6, %v366_v28, %v358_v25  ;;  %v537_v28 = vld [vmem:[%s2379_s4] sm:$0xff] }
  0x8e   : > { %v392_v34 = vsel %vm391_vm7, %v388_v31, %v390_v24  ;;  %v393_v35 = vsel %vm391_vm7, %v390_v24, %v388_v31  ;;  %v1711_v36 = vpack.i.bf16 %v379_v33, %v378_v32 }
  0x8f   : > { %v406_v37 = vsel %vm404_vm8, %v392_v34, %v386_v30  ;;  %v405_v38 = vsel %vm403_vm9, %v393_v35, %v385_v29  ;;  %v1698_v41 = vpop.permute.xlu1 %1697 }
  0x90   : > { %1712 = vrot.lane.b32.xlu1 %v1711_v36, %s1883_s18  ;;  %1702 = vrot.lane.b32.xlu0 %v1711_v36, %s1882_s15  ;;  %v1706_v39 = vpack.i.bf16 %v406_v37, %v405_v38  ;;  %v1700_v42 = vunpack.i.h.bf16 %v1698_v41  ;;  %v1699_v43 = vunpack.i.l.bf16 %v1698_v41  ;;  %v1609_v5 = vpack.c.bf16 %v406_v37, %v1952_v2 }
  0x91   : > { %v1611_v7 = vpack.c.bf16 %v405_v38, %v1950_v1  ;;  %v445_v1 = vld [vmem:[%s2377_s2] sm:$0xff] }
  0x92   : > { %v418_v47 = vsel %vm411_vm10, %v1699_v43, %v1700_v42  ;;  %v419_v48 = vsel %vm411_vm10, %v1700_v42, %v1699_v43 }
  0x94   : > { %439 = vrot.lane.b32.xlu1 %v405_v38, %s1883_s18  ;;  %1707 = vrot.lane.b32.xlu0 %v1706_v39, %s1882_s15 }
  0x98   : > { %1717 = vrot.lane.b32.xlu0 %v1686_v3, %s1883_s18 }
  0x9c   : > { %441 = vrot.lane.b32.xlu0 %v406_v37, %s1883_s18 }
 0x102   : > { %v1703_v44 = vpop.permute.xlu0 %1702  ;;  %v1713_v56 = vpop.permute.xlu1 %1712 }
 0x103   : > { %v1705_v45 = vunpack.i.h.bf16 %v1703_v44  ;;  %v1704_v46 = vunpack.i.l.bf16 %v1703_v44  ;;  %v1715_v62 = vunpack.i.h.bf16 %v1713_v56  ;;  %v1714_v63 = vunpack.i.l.bf16 %v1713_v56 }
 0x105   : > { %v412_v49 = vsel %vm411_vm10, %v1704_v46, %v1705_v45  ;;  %v413_v50 = vsel %vm411_vm10, %v1705_v45, %v1704_v46  ;;  %v432_v8 = vsel %vm430_vm11, %v1715_v62, %v1714_v63  ;;  %v431_v2 = vsel %vm430_vm11, %v1714_v63, %v1715_v62 }
 0x106   : > { %v1708_v51 = vpop.permute.xlu0 %1707  ;;  %v1601_v52 = vpack.c.bf16 %v418_v47, %v412_v49  ;;  %v1603_v53 = vpack.c.bf16 %v419_v48, %v413_v50  ;;  %v440_v16 = vpop.permute.xlu1 %439  ;;  %v729_v49 = vld [vmem:[%s335_s10 + $0x8] sm:$0xff]  ;;  %v728_v50 = vld [vmem:[%s335_s10] sm:$0xff] }
 0x107   : > { %v1710_v54 = vunpack.i.h.bf16 %v1708_v51  ;;  %v1709_v55 = vunpack.i.l.bf16 %v1708_v51 }
 0x108   : > { %1602 = vmatprep.subr.bf16.mxu0 %v1601_v52 }
 0x109   : > { %1604 = vmatpush1.bf16.msra.mxu0 %v1603_v53  ;;  %v424_v57 = vsel %vm411_vm10, %v1709_v55, %v1710_v54  ;;  %v425_v58 = vsel %vm411_vm10, %v1710_v54, %v1709_v55  ;;  %v1885_v54 = vmov 1  }
 0x10a   : > { %v1718_v59 = vpop.permute.xlu0 %1717  ;;  %v1605_v60 = vpack.c.bf16 %v379_v33, %v424_v57  ;;  %v1607_v61 = vpack.c.bf16 %v378_v32, %v425_v58  ;;  %v538_v32 = vld [vmem:[%s2379_s4 + $0x8] sm:$0xff] }
 0x10b   : > { %v1720_v3 = vunpack.i.h.bf16 %v1718_v59  ;;  %v1719_v4 = vunpack.i.l.bf16 %v1718_v59 }
 0x10c   : > { %1606 = vmatprep.subr.bf16.mxu0 %v1605_v60 }
 0x10d   : > { %1608 = vmatpush1.bf16.msra.mxu0 %v1607_v61  ;;  %v438_v6 = vsel %vm430_vm11, %v1720_v3, %v1719_v4  ;;  %v437_v10 = vsel %vm430_vm11, %v1719_v4, %v1720_v3 }
 0x10e   : > { %1610 = vmatprep.subr.bf16.mxu0 %v1609_v5  ;;  %v1613_v9 = vpack.c.bf16 %v438_v6, %v432_v8  ;;  %v442_v11 = vpop.permute.xlu0 %441  ;;  %v1615_v13 = vpack.c.bf16 %v437_v10, %v431_v2 }
 0x10f   : > { %v444_v19 = vsel %vm430_vm11, %v442_v11, %v440_v16  ;;  %v443_v20 = vsel %vm430_vm11, %v440_v16, %v442_v11 }
 0x111   : > { %1612 = vmatpush1.bf16.msra.mxu0 %v1611_v7 }
 0x112   : > { %1614 = vmatprep.subr.bf16.mxu0 %v1613_v9 }
 0x115   : > { %1616 = vmatpush1.bf16.msra.mxu0 %v1615_v13 }
 0x116   : > { %470 = vmatprep.subr.mxu0 %v444_v19 }
 0x119   : > { %471 = vmatpush1.msra.mxu0 %v443_v20 }
 0x11a   : > { %1539 = vmatmul.mubr.msk.f32.vlgmr.msra.gmra.mrb[0].mxu0 %vm447_vm12, %v445_v1 }
 0x11b   : > { %524 = vmatprep.mubr.f32.mxu0 %v1884_v40 }
 0x11e   : > { %1540 = vmatmul.mubr.msk.f32.gmra.mrb[2].mxu0 %vm447_vm12, %v446_v21 }
 0x11f   : > { %1577 = vmatprep.mubr.msk.f32.mxu0 %vm539_vm13, %v537_v28 }
 0x1ed   : > { %v520_v22 = vpop.f32.mrb[0].mxu0 }
 0x1ee   : > { %v522_v23 = vpop.f32.mrb[1].mxu0 }
 0x1ef   : > { %v531_v24 = vadd.f32 %v522_v23, %v520_v22 }
 0x1f1   : > { %532 = vadd.xlane.f32.xlu1 %v531_v24  ;;  %v526_v25 = vpop.f32.mrb[2].mxu0 }
 0x1f2   : > { %v528_v26 = vpop.f32.mrb[3].mxu0 }
 0x1f3   : > { %v534_v27 = vadd.f32 %v528_v26, %v526_v25 }
 0x1f5   : > { %535 = vadd.xlane.f32.xlu0 %v534_v27 }
 0x27e   : > { %v533_v29 = vpop.xlane.xlu1 %532 }
 0x282   : > { %v536_v30 = vpop.xlane.xlu0 %535 }
 0x283   : > { %v1617_v31 = vpack.c.bf16 %v536_v30, %v533_v29 }
 0x285   : > { %1618 = vmatprep.subr.bf16.mxu0 %v1617_v31 }
 0x286   : > { %1620 = vmatpush3.bf16.msra.mxu0 %v1617_v31 }
 0x289   : > { %1578 = vmatmul.mubr.msk.f32.vlgmr.msra.gmra.mrb[4].mxu0 %vm539_vm13, %v538_v32 }
 0x28a   : > { %1584 = vmatprep.mubr.msk.f32.mxu0 %vm539_vm13, %v537_v28 }
 0x35c   : > { %v1579_v33 = vpop.f32.mrb[4].mxu0 }
 0x35d   : > { %v622_v34 = vmul.f32 0.001953125, %v1579_v33  ;;  %v612_v35 = vpop.f32.mrb[5].mxu0 }
 0x35e   : > { %v621_v36 = vmul.f32 0.001953125, %v612_v35 }
 0x35f   : > { %630 = vperm.xlu1 %1722, %v622_v34  }
 0x360   : > { %625 = vperm.xlu0 %1721, %v621_v36  }
 0x3de   : > { %v631_v37 = vpop.permute.xlu1 %630 }
 0x3df   : > { %v635_v38 = vsub.f32 %v526_v25, %v631_v37  ;;  %v636_v39 = vsub.f32 %v528_v26, %v631_v37  ;;  %v626_v40 = vpop.permute.xlu0 %625 }
 0x3e0   : > { %v633_v41 = vsub.f32 %v520_v22, %v626_v40  ;;  %v634_v42 = vsub.f32 %v522_v23, %v626_v40 }
 0x3e1   : > { %v639_v43 = vmul.f32 %v635_v38, %v635_v38  ;;  %v640_v44 = vmul.f32 %v636_v39, %v636_v39 }
 0x3e2   : > { %v637_v45 = vmul.f32 %v633_v41, %v633_v41  ;;  %v638_v46 = vmul.f32 %v634_v42, %v634_v42 }
 0x3e3   : > { %v644_v47 = vadd.f32 %v640_v44, %v639_v43 }
 0x3e4   : > { %v641_v48 = vadd.f32 %v638_v46, %v637_v45 }
 0x3e5   : > { %645 = vadd.xlane.f32.xlu0 %v644_v47 }
 0x3e6   : > { %642 = vadd.xlane.f32.xlu1 %v641_v48 }
 0x3f7   : > { %751 = vperm.xlu1 %1722, %v729_v49  }
 0x3fb   : > { %746 = vperm.xlu0 %1721, %v728_v50   ;;  %1723 = vset.pattern.permute.xlu1 %v1885_v54 }
 0x3fc   : > { %759 = vperm.xlu1 %1723, %v728_v50  }
 0x400   : > { %1724 = vset.pattern.permute.xlu1 %v1877_v0 }
 0x472   : > { %v646_v51 = vpop.xlane.xlu0 %645 }
 0x473   : > { %v643_v52 = vpop.xlane.xlu1 %642 }
 0x474   : > { %v1621_v53 = vpack.c.bf16 %v646_v51, %v643_v52 }
 0x476   : > { %1622 = vmatprep.subr.bf16.mxu0 %v1621_v53 }
 0x477   : > { %1624 = vmatpush3.bf16.msra.mxu0 %v1621_v53  ;;  %v752_v63 = vpop.permute.xlu1 %751 }
 0x47a   : > { %1585 = vmatmul.mubr.msk.f32.vlgmr.msra.gmra.mrb[6].mxu0 %vm539_vm13, %v538_v32  ;;  %v747_v10 = vpop.permute.xlu0 %746 }
 0x47b   : > { %v760_v3 = vpop.permute.xlu1 %759 }
 0x54d   : > { %v1586_v55 = vpop.f32.mrb[6].mxu0 }
 0x54e   : > { %v723_v56 = vmul.f32 0.001953125, %v1586_v55  ;;  %v713_v57 = vpop.f32.mrb[7].mxu0 }
 0x54f   : > { %v722_v58 = vmul.f32 0.001953125, %v713_v57 }
 0x550   : > { %v725_v59 = vadd.f32 1e-05, %v723_v56 }
 0x551   : > { %v724_v60 = vadd.f32 1e-05, %v722_v58 }
 0x552   : > { %1829 = vrsqrt.f32 %v725_v59 }
 0x553   : > { %1831 = vrsqrt.f32 %v724_v60 }
 0x55c   : > { %v1830_v61 = vpop.eup %1829 }
 0x55d   : > { %737 = vperm.xlu1 %1724, %v1830_v61   ;;  %v1832_v62 = vpop.eup %1831 }
 0x561   : > { %732 = vperm.xlu1 %1724, %v1832_v62  }
 0x565   : > { %1725 = vset.pattern.permute.xlu1 %v1885_v54 }
 0x566   : > { %763 = vperm.xlu1 %1725, %v729_v49  }
 0x56a   : > { %1826 = vset.pattern.permute.xlu1 %v1877_v0 }
 0x5dc   : > { %v738_v4 = vpop.permute.xlu1 %737 }
 0x5dd   : > { %v742_v5 = vmul.f32 %v738_v4, %v635_v38  ;;  %v743_v6 = vmul.f32 %v738_v4, %v636_v39 }
 0x5df   : > { %v756_v13 = vmul.f32 %v752_v63, %v742_v5  ;;  %v757_v16 = vmul.f32 %v752_v63, %v743_v6 }
 0x5e0   : > { %v733_v7 = vpop.permute.xlu1 %732 }
 0x5e1   : > { %v740_v8 = vmul.f32 %v733_v7, %v633_v41  ;;  %v741_v9 = vmul.f32 %v733_v7, %v634_v42 }
 0x5e3   : > { %v754_v11 = vmul.f32 %v747_v10, %v740_v8  ;;  %v755_v2 = vmul.f32 %v747_v10, %v741_v9 }
 0x5e5   : > { %v2072_v19 = vadd.f32 %v760_v3, %v754_v11  ;;  %v2074_v1 = vadd.f32 %v760_v3, %v755_v2  ;;  %v764_v20 = vpop.permute.xlu1 %763 }
 0x5e6   : > { %v2076_v21 = vadd.f32 %v764_v20, %v756_v13  ;;  %v2078_v0 = vadd.f32 %v764_v20, %v757_v16 }
 0x5e7   : > { %v2081_v22 = vmul.f32 0.70710677, %v2072_v19  ;;  %v2084_v23 = vmul.f32 0.70710677, %v2074_v1 }
 0x5e8   : > { %v2087_v24 = vmul.f32 0.70710677, %v2076_v21  ;;  %v2090_v25 = vmul.f32 0.70710677, %v2078_v0 }
 0x5e9   : > { %v778_v26 = vand.u32 2147483647, %v2081_v22  ;;  %v779_v27 = vand.u32 2147483647, %v2084_v23  ;;  %vm858_vm14 = vcmp.ge.f32.partialorder %v2081_v22, 0.0  ;;  %vm859_vm15 = vcmp.ge.f32.partialorder %v2084_v23, 0.0 }
 0x5ea   : > { %v780_v28 = vand.u32 2147483647, %v2087_v24  ;;  %v781_v29 = vand.u32 2147483647, %v2090_v25  ;;  %vm860_vm0 = vcmp.ge.f32.partialorder %v2087_v24, 0.0  ;;  %vm861_vm1 = vcmp.ge.f32.partialorder %v2090_v25, 0.0 }
 0x5eb   : > { %v782_v30 = vmul.f32 0.3275911, %v778_v26  ;;  %v783_v31 = vmul.f32 0.3275911, %v779_v27  ;;  %v834_v38 = vsub.f32 0.0, %v778_v26  ;;  %v835_v39 = vsub.f32 0.0, %v779_v27 }
 0x5ec   : > { %v784_v32 = vmul.f32 0.3275911, %v780_v28  ;;  %v785_v33 = vmul.f32 0.3275911, %v781_v29  ;;  %v836_v42 = vsub.f32 0.0, %v780_v28  ;;  %v837_v46 = vsub.f32 0.0, %v781_v29 }
 0x5ed   : > { %v786_v34 = vadd.f32 1.0, %v782_v30  ;;  %v787_v35 = vadd.f32 1.0, %v783_v31  ;;  %v838_v41 = vmul.f32 %v834_v38, %v778_v26  ;;  %v839_v45 = vmul.f32 %v835_v39, %v779_v27 }
 0x5ee   : > { %v788_v36 = vadd.f32 1.0, %v784_v32  ;;  %v789_v37 = vadd.f32 1.0, %v785_v33  ;;  %v840_v52 = vmul.f32 %v836_v42, %v780_v28  ;;  %v841_v58 = vmul.f32 %v837_v46, %v781_v29 }
 0x5ef   : > { %1833 = vrcp.f32 %v786_v34  ;;  %v842_v51 = vmul.f32 1.442695, %v838_v41  ;;  %v844_v56 = vmul.f32 1.442695, %v839_v45  ;;  %v772_v23 = vmul.f32 0.5, %v2076_v21 }
 0x5f0   : > { %1835 = vrcp.f32 %v787_v35  ;;  %v846_v4 = vmul.f32 1.442695, %v840_v52  ;;  %v848_v7 = vmul.f32 1.442695, %v841_v58 }
 0x5f1   : > { %1837 = vrcp.f32 %v788_v36 }
 0x5f2   : > { %1839 = vrcp.f32 %v789_v37 }
 0x5f3   : > { %1841 = vpow2.f32 %v842_v51 }
 0x5f4   : > { %1843 = vpow2.f32 %v844_v56 }
 0x5f5   : > { %1845 = vpow2.f32 %v846_v4 }
 0x5f6   : > { %1847 = vpow2.f32 %v848_v7 }
 0x5f9   : > { %v1834_v40 = vpop.eup %1833 }
 0x5fa   : > { %v1836_v43 = vpop.eup %1835  ;;  %v798_v44 = vmul.f32 1.0614054, %v1834_v40 }
 0x5fb   : > { %v799_v47 = vmul.f32 1.0614054, %v1836_v43  ;;  %v1838_v49 = vpop.eup %1837 }
 0x5fc   : > { %v802_v48 = vadd.f32 -1.4531521, %v798_v44  ;;  %v1840_v53 = vpop.eup %1839  ;;  %v800_v57 = vmul.f32 1.0614054, %v1838_v49 }
 0x5fd   : > { %v803_v50 = vadd.f32 -1.4531521, %v799_v47  ;;  %v801_v60 = vmul.f32 1.0614054, %v1840_v53  ;;  %v1842_v34 = vpop.eup %1841 }
 0x5fe   : > { %v806_v55 = vmul.f32 %v1834_v40, %v802_v48  ;;  %v804_v62 = vadd.f32 -1.4531521, %v800_v57  ;;  %v1844_v37 = vpop.eup %1843 }
 0x5ff   : > { %v807_v59 = vmul.f32 %v1836_v43, %v803_v50  ;;  %v805_v3 = vadd.f32 -1.4531521, %v801_v60  ;;  %v1846_v46 = vpop.eup %1845 }
 0x600   : > { %v810_v61 = vadd.f32 1.4214138, %v806_v55  ;;  %v808_v6 = vmul.f32 %v1838_v49, %v804_v62  ;;  %v1848_v50 = vpop.eup %1847  ;;  %v771_v62 = vmul.f32 0.5, %v2074_v1 }
 0x601   : > { %v811_v63 = vadd.f32 1.4214138, %v807_v59  ;;  %v809_v9 = vmul.f32 %v1840_v53, %v805_v3 }
 0x602   : > { %v814_v5 = vmul.f32 %v1834_v40, %v810_v61  ;;  %v812_v11 = vadd.f32 1.4214138, %v808_v6  ;;  %v773_v6 = vmul.f32 0.5, %v2078_v0 }
 0x603   : > { %v815_v8 = vmul.f32 %v1836_v43, %v811_v63  ;;  %v813_v13 = vadd.f32 1.4214138, %v809_v9 }
 0x604   : > { %v818_v10 = vadd.f32 -0.28449672, %v814_v5  ;;  %v816_v20 = vmul.f32 %v1838_v49, %v812_v11 }
 0x605   : > { %v819_v2 = vadd.f32 -0.28449672, %v815_v8  ;;  %v817_v27 = vmul.f32 %v1840_v53, %v813_v13 }
 0x606   : > { %v822_v16 = vmul.f32 %v1834_v40, %v818_v10  ;;  %v820_v29 = vadd.f32 -0.28449672, %v816_v20 }
 0x607   : > { %v823_v26 = vmul.f32 %v1836_v43, %v819_v2  ;;  %v821_v31 = vadd.f32 -0.28449672, %v817_v27 }
 0x608   : > { %v826_v28 = vadd.f32 0.2548296, %v822_v16  ;;  %v824_v33 = vmul.f32 %v1838_v49, %v820_v29 }
 0x609   : > { %v827_v30 = vadd.f32 0.2548296, %v823_v26  ;;  %v825_v36 = vmul.f32 %v1840_v53, %v821_v31 }
 0x60a   : > { %v830_v32 = vmul.f32 %v1834_v40, %v826_v28  ;;  %v828_v39 = vadd.f32 0.2548296, %v824_v33 }
 0x60b   : > { %v831_v35 = vmul.f32 %v1836_v43, %v827_v30  ;;  %v829_v42 = vadd.f32 0.2548296, %v825_v36 }
 0x60c   : > { %v850_v38 = vmul.f32 %v1842_v34, %v830_v32  ;;  %v832_v45 = vmul.f32 %v1838_v49, %v828_v39  ;;  %v770_v49 = vmul.f32 0.5, %v2072_v19 }
 0x60d   : > { %v851_v41 = vmul.f32 %v1844_v37, %v831_v35  ;;  %v833_v48 = vmul.f32 %v1840_v53, %v829_v42 }
 0x60e   : > { %v854_v44 = vsub.f32 1.0, %v850_v38  ;;  %v852_v52 = vmul.f32 %v1846_v46, %v832_v45 }
 0x60f   : > { %v855_v47 = vsub.f32 1.0, %v851_v41  ;;  %v853_v55 = vmul.f32 %v1848_v50, %v833_v48 }
 0x610   : > { %v862_v51 = vsub.f32 0.0, %v854_v44  ;;  %v856_v56 = vsub.f32 1.0, %v852_v52 }
 0x611   : > { %v863_v40 = vsub.f32 0.0, %v855_v47  ;;  %v857_v59 = vsub.f32 1.0, %v853_v55 }
 0x612   : > { %v866_v43 = vsel %vm858_vm14, %v854_v44, %v862_v51  ;;  %v864_v61 = vsub.f32 0.0, %v856_v56 }
 0x613   : > { %v867_v57 = vsel %vm859_vm15, %v855_v47, %v863_v40  ;;  %v870_v58 = vadd.f32 1.0, %v866_v43  ;;  %v865_v53 = vsub.f32 0.0, %v857_v59 }
 0x614   : > { %v871_v60 = vadd.f32 1.0, %v867_v57  ;;  %v868_v22 = vsel %vm860_vm0, %v856_v56, %v864_v61 }
 0x615   : > { %v2102_v63 = vmul.f32 %v870_v58, %v770_v49  ;;  %v869_v3 = vsel %vm861_vm1, %v857_v59, %v865_v53  ;;  %v872_v4 = vadd.f32 1.0, %v868_v22 }
 0x616   : > { %v2105_v5 = vmul.f32 %v871_v60, %v771_v62  ;;  %v873_v7 = vadd.f32 1.0, %v869_v3 }
 0x617   : > { %v2108_v19 = vmul.f32 %v872_v4, %v772_v23 }
 0x618   : > { %v2110_v24 = vmul.f32 %v873_v7, %v773_v6 }
 0x619   : > { %v2114_v1 = vpack.i.bf16 %v2108_v19, %v2102_v63  ;;  %v1643_v0 = vpack.c.bf16 %v2108_v19, %v2102_v63 }
 0x61a   : > { %v2118_v25 = vpack.i.bf16 %v2110_v24, %v2105_v5  ;;  %v1641_v21 = vpack.c.bf16 %v2110_v24, %v2105_v5 }
 0x61b   : > { %1727 = vrot.lane.b32.xlu1 %v2114_v1, %s1879_s12 }
 0x61c   : > { %1742 = vrot.lane.b32.xlu0 %v2118_v25, %s1880_s13 }
 0x61f   : > { %1732 = vrot.lane.b32.xlu1 %v2118_v25, %s1879_s12 }
 0x620   : > { %1752 = vrot.lane.b32.xlu0 %v2118_v25, %s1878_s11 }
 0x623   : > { %1737 = vrot.lane.b32.xlu1 %v2114_v1, %s1880_s13 }
 0x624   : > { %1762 = vrot.lane.b32.xlu0 %v2118_v25, %s1881_s14 }
 0x627   : > { %1747 = vrot.lane.b32.xlu1 %v2114_v1, %s1878_s11 }
 0x62b   : > { %1757 = vrot.lane.b32.xlu1 %v2114_v1, %s1881_s14 }
 0x68d   : > { %v1728_v8 = vpop.permute.xlu1 %1727 }
 0x68e   : > { %v1743_v9 = vpop.permute.xlu0 %1742  ;;  %v1730_v13 = vunpack.i.h.bf16 %v1728_v8  ;;  %v1729_v16 = vunpack.i.l.bf16 %v1728_v8 }
 0x68f   : > { %v1745_v27 = vunpack.i.h.bf16 %v1743_v9  ;;  %v1744_v28 = vunpack.i.l.bf16 %v1743_v9 }
 0x691   : > { %v1733_v10 = vpop.permute.xlu1 %1732 }
 0x692   : > { %v1735_v11 = vunpack.i.h.bf16 %v1733_v10  ;;  %v1734_v2 = vunpack.i.l.bf16 %v1733_v10  ;;  %v1753_v20 = vpop.permute.xlu0 %1752 }
 0x693   : > { %v1755_v15 = vunpack.i.h.bf16 %v1753_v20  ;;  %v1754_v40 = vunpack.i.l.bf16 %v1753_v20 }
 0x694   : > { %v886_v31 = vsel %vm357_vm2, %v1729_v16, %v1734_v2  ;;  %v887_v32 = vsel %vm357_vm2, %v1730_v13, %v1735_v11  ;;  %v888_v33 = vsel %vm357_vm2, %v1734_v2, %v1729_v16  ;;  %v889_v34 = vsel %vm357_vm2, %v1735_v11, %v1730_v13 }
 0x695   : > { %v1738_v26 = vpop.permute.xlu1 %1737 }
 0x696   : > { %v1740_v29 = vunpack.i.h.bf16 %v1738_v26  ;;  %v1739_v30 = vunpack.i.l.bf16 %v1738_v26  ;;  %v1763_v48 = vpop.permute.xlu0 %1762 }
 0x697   : > { %v1765_v43 = vunpack.i.h.bf16 %v1763_v48  ;;  %v1764_v56 = vunpack.i.l.bf16 %v1763_v48 }
 0x698   : > { %v899_v35 = vsel %vm364_vm4, %v1740_v29, %v1745_v27  ;;  %v901_v36 = vsel %vm364_vm4, %v1745_v27, %v1740_v29  ;;  %v898_v37 = vsel %vm364_vm4, %v1739_v30, %v1744_v28  ;;  %v900_v38 = vsel %vm364_vm4, %v1744_v28, %v1739_v30 }
 0x699   : > { %v1748_v39 = vpop.permute.xlu1 %1747  ;;  %v2158_v41 = vsel %vm376_vm5, %v898_v37, %v888_v33  ;;  %v2162_v42 = vsel %vm376_vm5, %v899_v35, %v889_v34  ;;  %v2166_v44 = vsel %vm377_vm6, %v900_v38, %v886_v31  ;;  %v2170_v45 = vsel %vm377_vm6, %v901_v36, %v887_v32 }
 0x69a   : > { %v1766_v46 = vpack.i.bf16 %v2162_v42, %v2158_v41  ;;  %v1776_v47 = vpack.i.bf16 %v2170_v45, %v2166_v44  ;;  %v1750_v50 = vunpack.i.h.bf16 %v1748_v39  ;;  %v1749_v51 = vunpack.i.l.bf16 %v1748_v39 }
 0x69b   : > { %v1637_v14 = vpack.c.bf16 %v2170_v45, %v2166_v44  ;;  %v1639_v52 = vpack.c.bf16 %v2162_v42, %v2158_v41 }
 0x69c   : > { %1767 = vrot.lane.b32.xlu1 %v1766_v46, %s1882_s15  ;;  %1777 = vrot.lane.b32.xlu0 %v1776_v47, %s1882_s15  ;;  %v915_v59 = vsel %vm384_vm3, %v1750_v50, %v1755_v15  ;;  %v917_v60 = vsel %vm384_vm3, %v1755_v15, %v1750_v50  ;;  %v914_v61 = vsel %vm384_vm3, %v1749_v51, %v1754_v40 }
 0x69d   : > { %v1758_v55 = vpop.permute.xlu1 %1757  ;;  %v916_v49 = vsel %vm384_vm3, %v1754_v40, %v1749_v51 }
 0x69e   : > { %v1760_v57 = vunpack.i.h.bf16 %v1758_v55  ;;  %v1759_v58 = vunpack.i.l.bf16 %v1758_v55 }
 0x6a0   : > { %v927_v53 = vsel %vm391_vm7, %v1760_v57, %v1765_v43  ;;  %v929_v62 = vsel %vm391_vm7, %v1765_v43, %v1760_v57  ;;  %v926_v22 = vsel %vm391_vm7, %v1759_v58, %v1764_v56  ;;  %v928_v23 = vsel %vm391_vm7, %v1764_v56, %v1759_v58  ;;  %1772 = vrot.lane.b32.xlu1 %v2114_v1, %s1882_s15 }
 0x6a1   : > { %1782 = vrot.lane.b32.xlu0 %v2118_v25, %s1882_s15  ;;  %v2204_v3 = vsel %vm403_vm9, %v928_v23, %v914_v61  ;;  %v2208_v4 = vsel %vm403_vm9, %v929_v62, %v915_v59  ;;  %v2212_v6 = vsel %vm404_vm8, %v926_v22, %v916_v49  ;;  %v2216_v7 = vsel %vm404_vm8, %v927_v53, %v917_v60 }
 0x6a2   : > { %v1786_v8 = vpack.i.bf16 %v2208_v4, %v2204_v3  ;;  %v1791_v9 = vpack.i.bf16 %v2216_v7, %v2212_v6  ;;  %v1645_v10 = vpack.c.bf16 %v2216_v7, %v2212_v6  ;;  %v1647_v18 = vpack.c.bf16 %v2208_v4, %v2204_v3 }
 0x6a4   : > { %1787 = vrot.lane.b32.xlu1 %v1786_v8, %s1882_s15 }
 0x6a5   : > { %1792 = vrot.lane.b32.xlu0 %v1791_v9, %s1882_s15 }
 0x6a8   : > { %1797 = vrot.lane.b32.xlu1 %v1766_v46, %s1883_s18 }
 0x6a9   : > { %1807 = vrot.lane.b32.xlu0 %v1776_v47, %s1883_s18 }
 0x6ac   : > { %1802 = vrot.lane.b32.xlu1 %v2114_v1, %s1883_s18 }
 0x6ad   : > { %1812 = vrot.lane.b32.xlu0 %v2118_v25, %s1883_s18 }
 0x6b0   : > { %1817 = vrot.lane.b32.xlu1 %v1786_v8, %s1883_s18 }
 0x6b1   : > { %1822 = vrot.lane.b32.xlu0 %v1791_v9, %s1883_s18 }
 0x70e   : > { %v1768_v11 = vpop.permute.xlu1 %1767  ;;  %v1778_v16 = vpop.permute.xlu0 %1777 }
 0x70f   : > { %v1770_v2 = vunpack.i.h.bf16 %v1768_v11  ;;  %v1769_v13 = vunpack.i.l.bf16 %v1768_v11  ;;  %v1780_v20 = vunpack.i.h.bf16 %v1778_v16  ;;  %v1779_v26 = vunpack.i.l.bf16 %v1778_v16 }
 0x711   : > { %v942_v25 = vsel %vm411_vm10, %v1769_v13, %v1779_v26  ;;  %v943_v27 = vsel %vm411_vm10, %v1770_v2, %v1780_v20  ;;  %v944_v28 = vsel %vm411_vm10, %v1779_v26, %v1769_v13  ;;  %v945_v29 = vsel %vm411_vm10, %v1780_v20, %v1770_v2 }
 0x712   : > { %v1773_v1 = vpop.permute.xlu1 %1772  ;;  %v1625_v33 = vpack.c.bf16 %v943_v27, %v942_v25  ;;  %v1627_v34 = vpack.c.bf16 %v945_v29, %v944_v28  ;;  %v1006_v29 = vld [vmem:[%s2378_s3] sm:$0xff] }
 0x713   : > { %v1775_v30 = vunpack.i.h.bf16 %v1773_v1  ;;  %v1774_v31 = vunpack.i.l.bf16 %v1773_v1  ;;  %v1783_v32 = vpop.permute.xlu0 %1782 }
 0x714   : > { %v1785_v35 = vunpack.i.h.bf16 %v1783_v32  ;;  %v1784_v36 = vunpack.i.l.bf16 %v1783_v32  ;;  %1626 = vmatprep.subr.bf16.mxu1 %v1625_v33 }
 0x715   : > { %1628 = vmatpush1.bf16.msra.mxu1 %v1627_v34 }
 0x716   : > { %v1788_v37 = vpop.permute.xlu1 %1787  ;;  %v954_v38 = vsel %vm411_vm10, %v1774_v31, %v1784_v36  ;;  %v955_v39 = vsel %vm411_vm10, %v1775_v30, %v1785_v35  ;;  %v956_v46 = vsel %vm411_vm10, %v1784_v36, %v1774_v31  ;;  %v957_v47 = vsel %vm411_vm10, %v1785_v35, %v1775_v30  ;;  %v1009_v30 = vld [vmem:[%s2378_s3 + $0x18] sm:$0xff] }
 0x717   : > { %v1790_v48 = vunpack.i.h.bf16 %v1788_v37  ;;  %v1789_v50 = vunpack.i.l.bf16 %v1788_v37  ;;  %v1793_v51 = vpop.permute.xlu0 %1792  ;;  %v1629_v15 = vpack.c.bf16 %v955_v39, %v954_v38  ;;  %v1631_v40 = vpack.c.bf16 %v957_v47, %v956_v46  ;;  %v1099_v37 = vld [vmem:[%s2380_s5] sm:$0xff]  ;;  %v1100_v47 = vld [vmem:[%s2380_s5 + $0x8] sm:$0xff] }
 0x718   : > { %v1795_v55 = vunpack.i.h.bf16 %v1793_v51  ;;  %v1794_v43 = vunpack.i.l.bf16 %v1793_v51  ;;  %1591 = vmatprep.mubr.msk.f32.mxu0 %vm539_vm13, %v1099_v37 }
 0x719   : > { %1630 = vmatprep.subr.bf16.mxu1 %v1629_v15 }
 0x71a   : > { %1632 = vmatpush1.bf16.msra.mxu1 %v1631_v40  ;;  %v966_v56 = vsel %vm411_vm10, %v1789_v50, %v1794_v43  ;;  %v967_v57 = vsel %vm411_vm10, %v1790_v48, %v1795_v55  ;;  %v968_v58 = vsel %vm411_vm10, %v1794_v43, %v1789_v50  ;;  %v969_v59 = vsel %vm411_vm10, %v1795_v55, %v1790_v48  ;;  %v1798_v60 = vpop.permute.xlu1 %1797 }
 0x71b   : > { %v1808_v61 = vpop.permute.xlu0 %1807  ;;  %v1633_v49 = vpack.c.bf16 %v967_v57, %v966_v56  ;;  %v1635_v53 = vpack.c.bf16 %v969_v59, %v968_v58  ;;  %v1800_v23 = vunpack.i.h.bf16 %v1798_v60  ;;  %v1799_v8 = vunpack.i.l.bf16 %v1798_v60 }
 0x71c   : > { %v1810_v9 = vunpack.i.h.bf16 %v1808_v61  ;;  %v1809_v17 = vunpack.i.l.bf16 %v1808_v61 }
 0x71d   : > { %1634 = vmatprep.subr.bf16.mxu1 %v1633_v49 }
 0x71e   : > { %1636 = vmatpush1.bf16.msra.mxu1 %v1635_v53  ;;  %v1803_v62 = vpop.permute.xlu1 %1802  ;;  %v980_v44 = vsel %vm430_vm11, %v1809_v17, %v1799_v8  ;;  %v981_v45 = vsel %vm430_vm11, %v1810_v9, %v1800_v23  ;;  %v978_v5 = vsel %vm430_vm11, %v1799_v8, %v1809_v17  ;;  %v979_v63 = vsel %vm430_vm11, %v1800_v23, %v1810_v9  ;;  %v1290_v23 = vld [vmem:[%s340_s25 + $0x8] sm:$0xff] }
 0x71f   : > { %1638 = vmatprep.subr.bf16.mxu1 %v1637_v14  ;;  %v1813_v22 = vpop.permute.xlu0 %1812  ;;  %v1805_v11 = vunpack.i.h.bf16 %v1803_v62  ;;  %v1804_v2 = vunpack.i.l.bf16 %v1803_v62  ;;  %v1649_v24 = vpack.c.bf16 %v981_v45, %v980_v44  ;;  %v1651_v6 = vpack.c.bf16 %v979_v63, %v978_v5 }
 0x720   : > { %v1815_v13 = vunpack.i.h.bf16 %v1813_v22  ;;  %v1814_v16 = vunpack.i.l.bf16 %v1813_v22  ;;  %v1289_v22 = vld [vmem:[%s340_s25] sm:$0xff] }
 0x722   : > { %1640 = vmatpush1.bf16.msra.mxu1 %v1639_v52  ;;  %v1818_v41 = vpop.permute.xlu1 %1817  ;;  %v992_v19 = vsel %vm430_vm11, %v1814_v16, %v1804_v2  ;;  %v991_v26 = vsel %vm430_vm11, %v1805_v11, %v1815_v13 }
 0x723   : > { %1642 = vmatprep.subr.bf16.mxu1 %v1641_v21  ;;  %v1823_v42 = vpop.permute.xlu0 %1822  ;;  %v993_v21 = vsel %vm430_vm11, %v1815_v13, %v1805_v11  ;;  %v1819_v14 = vunpack.i.l.bf16 %v1818_v41 }
 0x724   : > { %v1825_v52 = vunpack.i.h.bf16 %v1823_v42  ;;  %v1824_v20 = vunpack.i.l.bf16 %v1823_v42  ;;  %v1653_v7 = vpack.c.bf16 %v993_v21, %v992_v19 }
 0x726   : > { %1644 = vmatpush1.bf16.msra.mxu1 %v1643_v0  ;;  %v1820_v0 = vunpack.i.h.bf16 %v1818_v41  ;;  %v1004_v1 = vsel %vm430_vm11, %v1824_v20, %v1819_v14  ;;  %v1002_v4 = vsel %vm430_vm11, %v1819_v14, %v1824_v20 }
 0x727   : > { %1646 = vmatprep.subr.bf16.mxu1 %v1645_v10  ;;  %v990_v10 = vsel %vm430_vm11, %v1804_v2, %v1814_v16 }
 0x728   : > { %v1005_v25 = vsel %vm430_vm11, %v1825_v52, %v1820_v0  ;;  %v1655_v27 = vpack.c.bf16 %v991_v26, %v990_v10 }
 0x729   : > { %v1657_v3 = vpack.c.bf16 %v1005_v25, %v1004_v1 }
 0x72a   : > { %1648 = vmatpush1.bf16.msra.mxu1 %v1647_v18  ;;  %v1003_v18 = vsel %vm430_vm11, %v1820_v0, %v1825_v52 }
 0x72b   : > { %1650 = vmatprep.subr.bf16.mxu1 %v1649_v24  ;;  %v1659_v28 = vpack.c.bf16 %v1003_v18, %v1002_v4 }
 0x72e   : > { %1652 = vmatpush1.bf16.msra.mxu1 %v1651_v6 }
 0x72f   : > { %1654 = vmatprep.subr.bf16.mxu1 %v1653_v7 }
 0x732   : > { %1656 = vmatpush1.bf16.msra.mxu1 %v1655_v27 }
 0x733   : > { %1658 = vmatprep.subr.bf16.mxu1 %v1657_v3 }
 0x736   : > { %1660 = vmatpush1.bf16.msra.mxu1 %v1659_v28 }
 0x739   : > { %1081 = vmatmul.mubr.f32.vlgmr.msra.gmra.mrb[0].mxu1 %v1006_v29 }
 0x73a   : > { %1546 = vmatprep.mubr.msk.f32.mxu1 %vm539_vm13, %v1009_v30 }
 0x73d   : > { %1087 = vmatmul.mubr.f32.gmra.mrb[2].mxu1 %v1008_v12 }
 0x80c   : > { %v1082_v31 = vpop.f32.mrb[0].mxu1 }
 0x80d   : > { %v1084_v32 = vpop.f32.mrb[1].mxu1 }
 0x80e   : > { %v1093_v33 = vadd.f32 %v1084_v32, %v1082_v31 }
 0x810   : > { %v1088_v34 = vpop.f32.mrb[2].mxu1  ;;  %1094 = vadd.xlane.f32.xlu1 %v1093_v33 }
 0x811   : > { %v1090_v35 = vpop.f32.mrb[3].mxu1 }
 0x812   : > { %v1096_v36 = vadd.f32 %v1090_v35, %v1088_v34 }
 0x814   : > { %1097 = vadd.xlane.f32.xlu0 %v1096_v36 }
 0x89d   : > { %v1095_v38 = vpop.xlane.xlu1 %1094 }
 0x8a1   : > { %v1098_v39 = vpop.xlane.xlu0 %1097 }
 0x8a2   : > { %v1661_v46 = vpack.c.bf16 %v1098_v39, %v1095_v38 }
 0x8a4   : > { %1662 = vmatprep.subr.bf16.mxu0 %v1661_v46 }
 0x8a5   : > { %1664 = vmatpush3.bf16.msra.mxu0 %v1661_v46 }
 0x8a8   : > { %1592 = vmatmul.mubr.msk.f32.vlgmr.msra.gmra.mrb[8].mxu0 %vm539_vm13, %v1100_v47 }
 0x8a9   : > { %1598 = vmatprep.mubr.msk.f32.mxu0 %vm539_vm13, %v1099_v37 }
 0x97b   : > { %v1593_v48 = vpop.f32.mrb[8].mxu0 }
 0x97c   : > { %v1183_v50 = vmul.f32 0.001953125, %v1593_v48  ;;  %v1173_v51 = vpop.f32.mrb[9].mxu0 }
 0x97d   : > { %v1182_v15 = vmul.f32 0.001953125, %v1173_v51 }
 0x97e   : > { %1191 = vperm.xlu1 %1826, %v1183_v50  }
 0x97f   : > { %1186 = vperm.xlu0 %1721, %v1182_v15  }
 0x9fd   : > { %v1192_v40 = vpop.permute.xlu1 %1191 }
 0x9fe   : > { %v1196_v55 = vsub.f32 %v1088_v34, %v1192_v40  ;;  %v1197_v43 = vsub.f32 %v1090_v35, %v1192_v40  ;;  %v1187_v56 = vpop.permute.xlu0 %1186 }
 0x9ff   : > { %v1194_v57 = vsub.f32 %v1082_v31, %v1187_v56  ;;  %v1195_v58 = vsub.f32 %v1084_v32, %v1187_v56 }
 0xa00   : > { %v1200_v59 = vmul.f32 %v1196_v55, %v1196_v55  ;;  %v1201_v60 = vmul.f32 %v1197_v43, %v1197_v43 }
 0xa01   : > { %v1198_v61 = vmul.f32 %v1194_v57, %v1194_v57  ;;  %v1199_v49 = vmul.f32 %v1195_v58, %v1195_v58 }
 0xa02   : > { %v1205_v53 = vadd.f32 %v1201_v60, %v1200_v59 }
 0xa03   : > { %v1202_v62 = vadd.f32 %v1199_v49, %v1198_v61 }
 0xa04   : > { %1206 = vadd.xlane.f32.xlu0 %v1205_v53 }
 0xa05   : > { %1203 = vadd.xlane.f32.xlu1 %v1202_v62 }
 0xa16   : > { %1307 = vperm.xlu1 %1826, %v1289_v22  }
 0xa1a   : > { %1312 = vperm.xlu0 %1721, %v1290_v23  }
 0xa91   : > { %v1207_v8 = vpop.xlane.xlu0 %1206 }
 0xa92   : > { %v1204_v9 = vpop.xlane.xlu1 %1203 }
 0xa93   : > { %v1665_v17 = vpack.c.bf16 %v1207_v8, %v1204_v9 }
 0xa95   : > { %1666 = vmatprep.subr.bf16.mxu0 %v1665_v17 }
 0xa96   : > { %1668 = vmatpush3.bf16.msra.mxu0 %v1665_v17  ;;  %v1308_v5 = vpop.permute.xlu1 %1307 }
 0xa99   : > { %1599 = vmatmul.mubr.msk.f32.vlgmr.msra.gmra.mrb[10].mxu0 %vm539_vm13, %v1100_v47  ;;  %v1313_v24 = vpop.permute.xlu0 %1312 }
 0xb6c   : > { %v1600_v11 = vpop.f32.mrb[10].mxu0 }
 0xb6d   : > { %v1284_v2 = vmul.f32 0.001953125, %v1600_v11  ;;  %v1274_v13 = vpop.f32.mrb[11].mxu0 }
 0xb6e   : > { %v1283_v16 = vmul.f32 0.001953125, %v1274_v13 }
 0xb6f   : > { %v1286_v44 = vadd.f32 1e-05, %v1284_v2 }
 0xb70   : > { %v1285_v45 = vadd.f32 1e-05, %v1283_v16 }
 0xb71   : > { %1849 = vrsqrt.f32 %v1286_v44 }
 0xb72   : > { %1851 = vrsqrt.f32 %v1285_v45 }
 0xb7b   : > { %v1850_v41 = vpop.eup %1849 }
 0xb7c   : > { %v1852_v42 = vpop.eup %1851  ;;  %1298 = vperm.xlu1 %1826, %v1850_v41  }
 0xb7d   : > { %1293 = vperm.xlu0 %1721, %v1852_v42  }
 0xb80   : > { %1827 = vset.pattern.permute.xlu1 %v1885_v54 }
 0xb81   : > { %1320 = vperm.xlu1 %1827, %v1289_v22   ;;  %1828 = vset.pattern.permute.xlu0 %v1885_v54 }
 0xb82   : > { %1324 = vperm.xlu0 %1828, %v1290_v23  }
 0xbfb   : > { %v1299_v63 = vpop.permute.xlu1 %1298 }
 0xbfc   : > { %v1303_v19 = vmul.f32 %v1299_v63, %v1196_v55  ;;  %v1304_v21 = vmul.f32 %v1299_v63, %v1197_v43  ;;  %v1294_v0 = vpop.permute.xlu0 %1293 }
 0xbfd   : > { %v1301_v14 = vmul.f32 %v1294_v0, %v1194_v57  ;;  %v1302_v52 = vmul.f32 %v1294_v0, %v1195_v58 }
 0xbfe   : > { %v1317_v10 = vmul.f32 %v1313_v24, %v1303_v19  ;;  %v1318_v26 = vmul.f32 %v1313_v24, %v1304_v21 }
 0xbff   : > { %v1315_v20 = vmul.f32 %v1308_v5, %v1301_v14  ;;  %v1316_v6 = vmul.f32 %v1308_v5, %v1302_v52 }
 0xc00   : > { %v1321_v7 = vpop.permute.xlu1 %1320 }
 0xc01   : > { %v2332_v1 = vadd.f32 %v1321_v7, %v1315_v20  ;;  %v2334_v25 = vadd.f32 %v1321_v7, %v1316_v6  ;;  %v1325_v27 = vpop.permute.xlu0 %1324 }
 0xc02   : > { %v2336_v54 = vadd.f32 %v1325_v27, %v1317_v10  ;;  %v2338_v3 = vadd.f32 %v1325_v27, %v1318_v26 }
 0xc03   : > { %v2341_v4 = vmul.f32 0.70710677, %v2332_v1  ;;  %v2344_v18 = vmul.f32 0.70710677, %v2334_v25 }
 0xc04   : > { %v2347_v28 = vmul.f32 0.70710677, %v2336_v54  ;;  %v2350_v29 = vmul.f32 0.70710677, %v2338_v3 }
 0xc05   : > { %v1339_v30 = vand.u32 2147483647, %v2341_v4  ;;  %v1340_v12 = vand.u32 2147483647, %v2344_v18  ;;  %vm1419_vm2 = vcmp.ge.f32.partialorder %v2341_v4, 0.0  ;;  %vm1420_vm3 = vcmp.ge.f32.partialorder %v2344_v18, 0.0 }
 0xc06   : > { %v1341_v31 = vand.u32 2147483647, %v2347_v28  ;;  %v1342_v32 = vand.u32 2147483647, %v2350_v29  ;;  %vm1421_vm4 = vcmp.ge.f32.partialorder %v2347_v28, 0.0  ;;  %vm1422_vm5 = vcmp.ge.f32.partialorder %v2350_v29, 0.0 }
 0xc07   : > { %v1343_v33 = vmul.f32 0.3275911, %v1339_v30  ;;  %v1344_v34 = vmul.f32 0.3275911, %v1340_v12  ;;  %v1395_v47 = vsub.f32 0.0, %v1339_v30  ;;  %v1396_v48 = vsub.f32 0.0, %v1340_v12 }
 0xc08   : > { %v1345_v35 = vmul.f32 0.3275911, %v1341_v31  ;;  %v1346_v36 = vmul.f32 0.3275911, %v1342_v32  ;;  %v1397_v15 = vsub.f32 0.0, %v1341_v31  ;;  %v1398_v56 = vsub.f32 0.0, %v1342_v32 }
 0xc09   : > { %v1347_v37 = vadd.f32 1.0, %v1343_v33  ;;  %v1348_v38 = vadd.f32 1.0, %v1344_v34  ;;  %v1399_v51 = vmul.f32 %v1395_v47, %v1339_v30  ;;  %v1400_v43 = vmul.f32 %v1396_v48, %v1340_v12 }
 0xc0a   : > { %v1349_v39 = vadd.f32 1.0, %v1345_v35  ;;  %v1350_v46 = vadd.f32 1.0, %v1346_v36  ;;  %v1401_v49 = vmul.f32 %v1397_v15, %v1341_v31  ;;  %v1402_v8 = vmul.f32 %v1398_v56, %v1342_v32 }
 0xc0b   : > { %1853 = vrcp.f32 %v1347_v37  ;;  %v1403_v61 = vmul.f32 1.442695, %v1399_v51  ;;  %v1405_v22 = vmul.f32 1.442695, %v1400_v43 }
 0xc0c   : > { %1855 = vrcp.f32 %v1348_v38  ;;  %v1407_v44 = vmul.f32 1.442695, %v1401_v49  ;;  %v1409_v42 = vmul.f32 1.442695, %v1402_v8  ;;  %v1332_v49 = vmul.f32 0.5, %v2334_v25 }
 0xc0d   : > { %1857 = vrcp.f32 %v1349_v39 }
 0xc0e   : > { %1859 = vrcp.f32 %v1350_v46 }
 0xc0f   : > { %1861 = vpow2.f32 %v1403_v61 }
 0xc10   : > { %1863 = vpow2.f32 %v1405_v22 }
 0xc11   : > { %1865 = vpow2.f32 %v1407_v44 }
 0xc12   : > { %1867 = vpow2.f32 %v1409_v42 }
 0xc15   : > { %v1854_v50 = vpop.eup %1853 }
 0xc16   : > { %v1856_v40 = vpop.eup %1855  ;;  %v1359_v55 = vmul.f32 1.0614054, %v1854_v50 }
 0xc17   : > { %v1360_v57 = vmul.f32 1.0614054, %v1856_v40  ;;  %v1858_v59 = vpop.eup %1857 }
 0xc18   : > { %v1363_v58 = vadd.f32 -1.4531521, %v1359_v55  ;;  %v1860_v53 = vpop.eup %1859  ;;  %v1361_v23 = vmul.f32 1.0614054, %v1858_v59 }
 0xc19   : > { %v1364_v60 = vadd.f32 -1.4531521, %v1360_v57  ;;  %v1362_v17 = vmul.f32 1.0614054, %v1860_v53  ;;  %v1862_v31 = vpop.eup %1861 }
 0xc1a   : > { %v1367_v62 = vmul.f32 %v1854_v50, %v1363_v58  ;;  %v1365_v2 = vadd.f32 -1.4531521, %v1361_v23  ;;  %v1864_v34 = vpop.eup %1863  ;;  %v1331_v58 = vmul.f32 0.5, %v2332_v1 }
 0xc1b   : > { %v1368_v9 = vmul.f32 %v1856_v40, %v1364_v60  ;;  %v1366_v16 = vadd.f32 -1.4531521, %v1362_v17  ;;  %v1866_v47 = vpop.eup %1865 }
 0xc1c   : > { %v1371_v11 = vadd.f32 1.4214138, %v1367_v62  ;;  %v1369_v41 = vmul.f32 %v1858_v59, %v1365_v2  ;;  %v1868_v15 = vpop.eup %1867 }
 0xc1d   : > { %v1372_v13 = vadd.f32 1.4214138, %v1368_v9  ;;  %v1370_v24 = vmul.f32 %v1860_v53, %v1366_v16  ;;  %v1333_v9 = vmul.f32 0.5, %v2336_v54 }
 0xc1e   : > { %v1375_v45 = vmul.f32 %v1854_v50, %v1371_v11  ;;  %v1373_v19 = vadd.f32 1.4214138, %v1369_v41 }
 0xc1f   : > { %v1376_v5 = vmul.f32 %v1856_v40, %v1372_v13  ;;  %v1374_v0 = vadd.f32 1.4214138, %v1370_v24  ;;  %v1334_v13 = vmul.f32 0.5, %v2338_v3 }
 0xc20   : > { %v1379_v63 = vadd.f32 -0.28449672, %v1375_v45  ;;  %v1377_v52 = vmul.f32 %v1858_v59, %v1373_v19 }
 0xc21   : > { %v1380_v21 = vadd.f32 -0.28449672, %v1376_v5  ;;  %v1378_v6 = vmul.f32 %v1860_v53, %v1374_v0 }
 0xc22   : > { %v1383_v14 = vmul.f32 %v1854_v50, %v1379_v63  ;;  %v1381_v10 = vadd.f32 -0.28449672, %v1377_v52 }
 0xc23   : > { %v1384_v20 = vmul.f32 %v1856_v40, %v1380_v21  ;;  %v1382_v27 = vadd.f32 -0.28449672, %v1378_v6 }
 0xc24   : > { %v1387_v7 = vadd.f32 0.2548296, %v1383_v14  ;;  %v1385_v12 = vmul.f32 %v1858_v59, %v1381_v10 }
 0xc25   : > { %v1388_v26 = vadd.f32 0.2548296, %v1384_v20  ;;  %v1386_v33 = vmul.f32 %v1860_v53, %v1382_v27 }
 0xc26   : > { %v1391_v30 = vmul.f32 %v1854_v50, %v1387_v7  ;;  %v1389_v36 = vadd.f32 0.2548296, %v1385_v12 }
 0xc27   : > { %v1392_v32 = vmul.f32 %v1856_v40, %v1388_v26  ;;  %v1390_v38 = vadd.f32 0.2548296, %v1386_v33 }
 0xc28   : > { %v1411_v35 = vmul.f32 %v1862_v31, %v1391_v30  ;;  %v1393_v46 = vmul.f32 %v1858_v59, %v1389_v36 }
 0xc29   : > { %v1412_v37 = vmul.f32 %v1864_v34, %v1392_v32  ;;  %v1394_v51 = vmul.f32 %v1860_v53, %v1390_v38 }
 0xc2a   : > { %v1415_v39 = vsub.f32 1.0, %v1411_v35  ;;  %v1413_v43 = vmul.f32 %v1866_v47, %v1393_v46 }
 0xc2b   : > { %v1416_v48 = vsub.f32 1.0, %v1412_v37  ;;  %v1414_v56 = vmul.f32 %v1868_v15, %v1394_v51 }
 0xc2c   : > { %v1423_v55 = vsub.f32 0.0, %v1415_v39  ;;  %v1417_v57 = vsub.f32 1.0, %v1413_v43 }
 0xc2d   : > { %v1424_v50 = vsub.f32 0.0, %v1416_v48  ;;  %v1418_v59 = vsub.f32 1.0, %v1414_v56 }
 0xc2e   : > { %v1427_v40 = vsel %vm1419_vm2, %v1415_v39, %v1423_v55  ;;  %v1425_v62 = vsub.f32 0.0, %v1417_v57 }
 0xc2f   : > { %v1428_v60 = vsel %vm1420_vm3, %v1416_v48, %v1424_v50  ;;  %v1431_v61 = vadd.f32 1.0, %v1427_v40  ;;  %v1426_v4 = vsub.f32 0.0, %v1418_v59 }
 0xc30   : > { %v1432_v53 = vadd.f32 1.0, %v1428_v60  ;;  %v1429_v23 = vsel %vm1421_vm4, %v1417_v57, %v1425_v62 }
 0xc31   : > { %v1435_v22 = vmul.f32 %v1431_v61, %v1331_v58  ;;  %v1430_v17 = vsel %vm1422_vm5, %v1418_v59, %v1426_v4  ;;  %v1433_v11 = vadd.f32 1.0, %v1429_v23 }
 0xc32   : > { %v1436_v18 = vmul.f32 %v1432_v53, %v1332_v49  ;;  %v1434_v28 = vadd.f32 1.0, %v1430_v17 }
 0xc33   : > { %v1439_v8 = vadd.f32 %v1435_v22, %v2332_v1  ;;  %v1437_v16 = vmul.f32 %v1433_v11, %v1333_v9 }
 0xc34   : > { %v1440_v2 = vadd.f32 %v1436_v18, %v2334_v25  ;;  %v1438_v44 = vmul.f32 %v1434_v28, %v1334_v13 }
 0xc35   : > { %1443 = vst [vmem:[%s345_s9] sm:$0xff] %v1439_v8  ;;  %v1441_v45 = vadd.f32 %v1437_v16, %v2336_v54 }
 0xc36   : > { %1444 = vst [vmem:[%s345_s9 + $0x8] sm:$0xff] %v1440_v2  ;;  %v1442_v29 = vadd.f32 %v1438_v44, %v2338_v3 }
 0xc37   : > { %1445 = vst [vmem:[%s345_s9 + $0x10] sm:$0xff] %v1441_v45 }
 0xc38   : > { %1446 = vst [vmem:[%s345_s9 + $0x18] sm:$0xff] %v1442_v29 }
 0xc39 PF: > { %s18_s27 = sadd.s32 1, %s1875_s27  }
 0xc3a   : > { %p15_p4 = scmp.ge.s32.totalorder %s18_s27, 4  }
 0xc3c   :  { %17 = sbr.rel (!%p15_p4) target bundleno = 1 (0x1), region = 88 }

</bundles_post_ra>
